<compile_context>
chip_gen: v7x
topology: tpu7x:2x2x1
jax: 0.10.0
libtpu: 0.0.40
codegen_flags: <defaults>
</compile_context>

<pallas_src>
import functools

import jax
import jax.numpy as jnp
from jax.experimental import pallas as pl
from jax.experimental.pallas import tpu as pltpu


def _round_up(v, m):
    return int(pl.cdiv(v, m) * m)


def _mlp_kernel(xm_ref, xt_ref, xb_ref, w1_ref, b1_ref, dw_ref, dwb_ref,
                w2_ref, b2_ref, o_ref, hbuf, *, TH, W, Hp):
    # One (batch, row-tile) grid step: fc1 -> dwconv3x3 -> GELU -> fc2 in VMEM.
    # xm_ref: (1, TH, W, C) tile rows;  xt_ref/xb_ref: (1, 1, W, C) halo rows
    # w1_ref: (C, Hp) bf16, b1_ref: (1, Hp) f32
    # dw_ref: (9, Hp) conv dtype (tap index ky*3+kx), dwb_ref: (1, Hp) conv dtype
    # w2_ref: (Hp, Op) bf16, b2_ref: (1, Op) f32
    # o_ref:  (1, TH, W, Op);  hbuf: (TH+2, W+2, Hp) f32 scratch (halo-padded)
    t = pl.program_id(1)
    n_tiles = pl.num_programs(1)

    w1 = w1_ref[...]
    b1 = b1_ref[...]
    mdt = w1.dtype

    # ---- fc1 on the tile rows, stored straight into the hbuf interior ----
    xm = xm_ref[0].reshape(TH * W, -1).astype(mdt)
    hm = jnp.dot(xm, w1, preferred_element_type=jnp.float32) + b1      # (TH*W, Hp)
    hbuf[1:TH + 1, 1:W + 1, :] = hm.reshape(TH, W, Hp)

    # ---- fc1 recomputed on the two halo rows (zeroed at the image border) ----
    xt = xt_ref[0, 0].astype(mdt)                                      # (W, C)
    ht = jnp.dot(xt, w1, preferred_element_type=jnp.float32) + b1
    ht = ht * (t > 0).astype(jnp.float32)
    hbuf[0:1, 1:W + 1, :] = ht.reshape(1, W, Hp)

    xb = xb_ref[0, 0].astype(mdt)
    hb = jnp.dot(xb, w1, preferred_element_type=jnp.float32) + b1
    hb = hb * (t < n_tiles - 1).astype(jnp.float32)
    hbuf[TH + 1:TH + 2, 1:W + 1, :] = hb.reshape(1, W, Hp)

    # ---- zero only the left/right halo columns (not the whole buffer) ----
    zcol = jnp.zeros((TH + 2, 1, Hp), jnp.float32)
    hbuf[:, 0:1, :] = zcol
    hbuf[:, W + 1:W + 2, :] = zcol

    # ---- depthwise 3x3 conv, channels-last; kx shifts hoisted out of the loop ----
    dw = dw_ref[...]                                 # (9, Hp) conv dtype
    dwb = dwb_ref[...]                               # (1, Hp) conv dtype
    cdt = dw.dtype
    acc = None
    for kx in range(3):
        # one sublane-shifted load per kx, reused across the three ky taps
        plane = hbuf[:, kx:kx + W, :].astype(cdt)    # (TH+2, W, Hp)
        for ky in range(3):
            tap = plane[ky:ky + TH] * dw[3 * ky + kx].reshape(1, 1, Hp)
            acc = tap if acc is None else acc + tap
    conv = acc + dwb.reshape(1, 1, Hp)

    # ---- GELU (+ Dropout(p=0.0) == identity) ----
    g = jax.nn.gelu(conv, approximate=True).reshape(TH * W, Hp)

    # ---- fc2 ----
    w2 = w2_ref[...]
    out = jnp.dot(g.astype(w2.dtype), w2, preferred_element_type=jnp.float32)
    out = out + b2_ref[...]
    o_ref[0] = out.reshape(TH, W, -1).astype(o_ref.dtype)


def mlp_forward(x, H, W, fc1_w, fc1_b, dw_w, dw_b, fc2_w, fc2_b, *,
                matmul_dtype=jnp.bfloat16, conv_dtype=jnp.bfloat16,
                act_vmem_budget=12 * 1024 * 1024, return_padded=False):
    """Segformer Mlp forward.

    x:     (B, N, C) tokens with N == H*W
    fc1_w: (Hid, C), fc1_b: (Hid,)          [PyTorch nn.Linear layout]
    dw_w:  (Hid, 1, 3, 3), dw_b: (Hid,)     [depthwise nn.Conv2d layout]
    fc2_w: (Out, Hid), fc2_b: (Out,)
    matmul_dtype: MXU operand dtype (bf16 on all current TPUs; f32 accumulation).
    conv_dtype:   depthwise-conv/GELU math dtype (bf16 on v6e/v7x, f32 on v5e).
    return_padded: if True and Out % 128 != 0, return the lane-padded
      (B, N, round_up(Out,128)) array so the consumer folds the channel slice
      instead of paying a separate HBM de-pad pass.
    returns (B, N, Out)  (or (B, N, Op) if return_padded)
    """
    B, N, C = x.shape
    assert N == H * W, "sequence length must equal H*W"
    Hid = fc1_w.shape[0]
    Out = fc2_w.shape[0]

    Hp = _round_up(Hid, 128)   # lane-dense hidden width
    Op = _round_up(Out, 128)   # lane-dense output width

    f32 = jnp.float32
    mdt, cdt = matmul_dtype, conv_dtype
    # Padded channels have zero weights/bias -> zero hidden -> GELU(0)=0 -> inert.
    w1 = jnp.zeros((C, Hp), mdt).at[:, :Hid].set(fc1_w.T.astype(mdt))
    b1 = jnp.zeros((1, Hp), f32).at[:, :Hid].set(fc1_b.astype(f32).reshape(1, Hid))
    dw = jnp.zeros((9, Hp), cdt).at[:, :Hid].set(dw_w.reshape(Hid, 9).T.astype(cdt))
    dwb = jnp.zeros((1, Hp), cdt).at[:, :Hid].set(dw_b.astype(cdt).reshape(1, Hid))
    w2 = jnp.zeros((Hp, Op), mdt).at[:Hid, :Out].set(fc2_w.T.astype(mdt))
    b2 = jnp.zeros((1, Op), f32).at[:, :Out].set(fc2_b.astype(f32).reshape(1, Out))

    # (B, N, C) tokens are row-major over (H, W): this reshape is free.
    x_img = x.reshape(B, H, W, C)
    x_bytes = x.dtype.itemsize
    o_bytes = x.dtype.itemsize
    m_bytes = jnp.dtype(mdt).itemsize
    c_bytes = jnp.dtype(cdt).itemsize

    # ---- row-tile size: cap per-step VMEM and give ~>=4 grid steps per image ----
    per_row = (2 * W * C * x_bytes            # x tile rows (double buffered)
               + 2 * W * Op * o_bytes         # out tile rows (double buffered)
               + (W + 2) * Hp * 4             # hbuf scratch rows (f32)
               + (4 * Hp + Op) * W * 4)       # in-kernel temporaries (generous)
    max_rows = max(1, act_vmem_budget // per_row)
    target = max(1, min(max_rows, (H + 3) // 4))
    TH = 1
    for d in range(1, H + 1):
        if H % d == 0 and d <= target:
            TH = d
    nT = H // TH

    weight_bytes = 2 * ((C * Hp + Hp * Op) * m_bytes
                        + 10 * Hp * c_bytes + (Hp + Op) * 4)
    halo_x_bytes = 2 * 2 * W * C * x_bytes
    hbuf_halo_bytes = 2 * (W + 2) * Hp * 4
    footprint = weight_bytes + halo_x_bytes + hbuf_halo_bytes + TH * per_row
    vmem_limit = int(min(48 * 1024 * 1024,
                         max(int(footprint * 1.5), 16 * 1024 * 1024)))

    flops = (2 * B * nT * (TH + 2) * W * C * Hp      # fc1 (+ halo recompute)
             + 2 * B * N * 9 * Hp                    # depthwise 3x3
             + 2 * B * N * Hp * Op)                  # fc2
    bytes_accessed = (B * nT * (TH + 2) * W * C * x_bytes + B * N * Op * o_bytes
                      + (C * Hp + Hp * Op) * m_bytes + 10 * Hp * c_bytes
                      + (Hp + Op) * 4)

    kernel = functools.partial(_mlp_kernel, TH=TH, W=W, Hp=Hp)

    out_img = pl.pallas_call(
        kernel,
        out_shape=jax.ShapeDtypeStruct((B, H, W, Op), x.dtype),
        grid_spec=pltpu.PrefetchScalarGridSpec(
            num_scalar_prefetch=0,
            grid=(B, nT),
            in_specs=[
                # x: current row tile + the two halo rows (fc1 recomputed on them)
                pl.BlockSpec((1, TH, W, C), lambda b, t: (b, t, 0, 0)),
                pl.BlockSpec((1, 1, W, C),
                             lambda b, t: (b, jnp.maximum(t * TH - 1, 0), 0, 0)),
                pl.BlockSpec((1, 1, W, C),
                             lambda b, t: (b, jnp.minimum(t * TH + TH, H - 1), 0, 0)),
                # constant-index operands (see TODO about pl.Buffered(1))
                pl.BlockSpec((C, Hp), lambda b, t: (0, 0)),    # fc1 weight
                pl.BlockSpec((1, Hp), lambda b, t: (0, 0)),    # fc1 bias
                pl.BlockSpec((9, Hp), lambda b, t: (0, 0)),    # dwconv taps
                pl.BlockSpec((1, Hp), lambda b, t: (0, 0)),    # dwconv bias
                pl.BlockSpec((Hp, Op), lambda b, t: (0, 0)),   # fc2 weight
                pl.BlockSpec((1, Op), lambda b, t: (0, 0)),    # fc2 bias
            ],
            out_specs=pl.BlockSpec((1, TH, W, Op), lambda b, t: (b, t, 0, 0)),
            scratch_shapes=[pltpu.VMEM((TH + 2, W + 2, Hp), jnp.float32)],
        ),
        compiler_params=pltpu.CompilerParams(
            dimension_semantics=("parallel", "parallel"),
            vmem_limit_bytes=vmem_limit,
        ),
        cost_estimate=pl.CostEstimate(
            flops=flops,
            transcendentals=B * N * Hp,
            bytes_accessed=bytes_accessed,
        ),
    )(x_img, x_img, x_img, w1, b1, dw, dwb, w2, b2)

    out = out_img.reshape(B, N, Op)
    if Op != Out and not return_padded:
        out = out[..., :Out]   # extra HBM pass; use return_padded=True to avoid it
    return out


if __name__ == "__main__":
    # Small shapes consistent with the module: in=32, hidden=64, out=in, 16x16 image
    B, H, W = 2, 16, 16
    N = H * W
    C_in, C_hidden = 32, 64
    C_out = C_in

    key = jax.random.PRNGKey(0)
    ks = jax.random.split(key, 7)
    x = jax.random.normal(ks[0], (B, N, C_in), dtype=jnp.float32)
    fc1_w = jax.random.normal(ks[1], (C_hidden, C_in), jnp.float32) * 0.02
    fc1_b = jax.random.normal(ks[2], (C_hidden,), jnp.float32) * 0.02
    dw_w = jax.random.normal(ks[3], (C_hidden, 1, 3, 3), jnp.float32) * 0.5
    dw_b = jax.random.normal(ks[4], (C_hidden,), jnp.float32) * 0.02
    fc2_w = jax.random.normal(ks[5], (C_out, C_hidden), jnp.float32) * 0.02
    fc2_b = jax.random.normal(ks[6], (C_out,), jnp.float32) * 0.02

    out = mlp_forward(x, H, W, fc1_w, fc1_b, dw_w, dw_b, fc2_w, fc2_b)
    out = jax.block_until_ready(out)

    # ---- pure-JAX f32 reference mirroring the PyTorch forward ----
    h_ref = x @ fc1_w.T + fc1_b                                   # (B, N, Hid)
    himg = jnp.transpose(h_ref, (0, 2, 1)).reshape(B, C_hidden, H, W)
    conv = jax.lax.conv_general_dilated(
        himg, dw_w, window_strides=(1, 1), padding=((1, 1), (1, 1)),
        dimension_numbers=("NCHW", "OIHW", "NCHW"),
        feature_group_count=C_hidden) + dw_b.reshape(1, C_hidden, 1, 1)
    conv_tok = jnp.transpose(conv.reshape(B, C_hidden, N), (0, 2, 1))
    g_ref = jax.nn.gelu(conv_tok, approximate=True)
    ref = g_ref @ fc2_w.T + fc2_b                                 # (B, N, Out)

    assert out.shape == (B, N, C_out), out.shape
    max_err = float(jnp.max(jnp.abs(out - ref)))
    # Tolerance accounts for the bf16 MXU/conv path (f32 accumulation kept).
    assert jnp.allclose(out, ref, atol=5e-3, rtol=2e-2), max_err
    print("KERNEL_OK")
</pallas_src>

<mosaic_0001>
module attributes {stable_mosaic.version = 11 : i64} {
  func.func @_mlp_kernel(%arg0: i32, %arg1: i32, %arg2: memref<1x4x16x32xf32, #tpu.memory_space<vmem>>, %arg3: memref<1x1x16x32xf32, #tpu.memory_space<vmem>>, %arg4: memref<1x1x16x32xf32, #tpu.memory_space<vmem>>, %arg5: memref<32x128xbf16, #tpu.memory_space<vmem>>, %arg6: memref<1x128xf32, #tpu.memory_space<vmem>>, %arg7: memref<9x128xbf16, #tpu.memory_space<vmem>>, %arg8: memref<1x128xbf16, #tpu.memory_space<vmem>>, %arg9: memref<128x128xbf16, #tpu.memory_space<vmem>>, %arg10: memref<1x128xf32, #tpu.memory_space<vmem>>, %arg11: memref<1x4x16x128xf32, #tpu.memory_space<vmem>>, %arg12: memref<6x18x128xf32, #tpu.memory_space<vmem>>) attributes {dimension_semantics = [#tpu.dimension_semantics<parallel>, #tpu.dimension_semantics<parallel>], iteration_bounds = array<i64: 2, 4>, scalar_prefetch = 0 : i64, scratch_operands = 1 : i64, tpu.core_type = #tpu.core_type<tc>, window_params = [{transform_indices = @transform_0, window_bounds = array<i64: 1, 4, 16, 32>}, {transform_indices = @transform_1, window_bounds = array<i64: 1, 1, 16, 32>}, {transform_indices = @transform_2, window_bounds = array<i64: 1, 1, 16, 32>}, {pipeline_mode = #tpu.pipeline_mode<synchronous>, transform_indices = @transform_3, window_bounds = array<i64: 32, 128>}, {pipeline_mode = #tpu.pipeline_mode<synchronous>, transform_indices = @transform_4, window_bounds = array<i64: 1, 128>}, {pipeline_mode = #tpu.pipeline_mode<synchronous>, transform_indices = @transform_5, window_bounds = array<i64: 9, 128>}, {pipeline_mode = #tpu.pipeline_mode<synchronous>, transform_indices = @transform_6, window_bounds = array<i64: 1, 128>}, {pipeline_mode = #tpu.pipeline_mode<synchronous>, transform_indices = @transform_7, window_bounds = array<i64: 128, 128>}, {pipeline_mode = #tpu.pipeline_mode<synchronous>, transform_indices = @transform_8, window_bounds = array<i64: 1, 128>}, {transform_indices = @transform_9, window_bounds = array<i64: 1, 4, 16, 128>}]} {
    %c0 = arith.constant 0 : index
    %c0_0 = arith.constant 0 : index
    %0 = vector.load %arg5[%c0, %c0_0] : memref<32x128xbf16, #tpu.memory_space<vmem>>, vector<32x128xbf16>
    %c0_1 = arith.constant 0 : index
    %c0_2 = arith.constant 0 : index
    %1 = vector.load %arg6[%c0_1, %c0_2] : memref<1x128xf32, #tpu.memory_space<vmem>>, vector<1x128xf32>
    %c0_3 = arith.constant 0 : index
    %c0_4 = arith.constant 0 : index
    %c0_5 = arith.constant 0 : index
    %c0_6 = arith.constant 0 : index
    %2 = vector.load %arg2[%c0_3, %c0_4, %c0_5, %c0_6] : memref<1x4x16x32xf32, #tpu.memory_space<vmem>>, vector<1x4x16x32xf32>
    %3 = vector.shape_cast %2 : vector<1x4x16x32xf32> to vector<4x16x32xf32>
    %4 = vector.shape_cast %3 : vector<4x16x32xf32> to vector<64x32xf32>
    %5 = arith.truncf %4 : vector<64x32xf32> to vector<64x32xbf16>
    %cst = arith.constant dense<0.000000e+00> : vector<64x128xf32>
    %6 = tpu.matmul %5, %0, %cst {dimension_numbers = #tpu.dot_dimension_numbers<[1], [0], [0], [1], [0, 0, 1, 1], [], []>} : vector<64x32xbf16>, vector<32x128xbf16>, vector<64x128xf32> -> vector<64x128xf32>
    %7 = vector.broadcast %1 : vector<1x128xf32> to vector<64x128xf32>
    %8 = arith.addf %6, %7 : vector<64x128xf32>
    %9 = vector.shape_cast %8 : vector<64x128xf32> to vector<4x16x128xf32>
    %c1 = arith.constant 1 : index
    %c1_7 = arith.constant 1 : index
    %c0_8 = arith.constant 0 : index
    %10 = vector.load %arg12[%c1, %c1_7, %c0_8] : memref<6x18x128xf32, #tpu.memory_space<vmem>>, vector<4x16x128xf32>
    tpu.vector_store %arg12[%c1, %c1_7, %c0_8], %9 {strides = array<i32>} : memref<6x18x128xf32, #tpu.memory_space<vmem>>, vector<4x16x128xf32>,
    %c0_9 = arith.constant 0 : index
    %c0_10 = arith.constant 0 : index
    %c0_11 = arith.constant 0 : index
    %c0_12 = arith.constant 0 : index
    %11 = vector.load %arg3[%c0_9, %c0_10, %c0_11, %c0_12] : memref<1x1x16x32xf32, #tpu.memory_space<vmem>>, vector<1x1x16x32xf32>
    %12 = vector.shape_cast %11 : vector<1x1x16x32xf32> to vector<16x32xf32>
    %13 = arith.truncf %12 : vector<16x32xf32> to vector<16x32xbf16>
    %cst_13 = arith.constant dense<0.000000e+00> : vector<16x128xf32>
    %14 = tpu.matmul %13, %0, %cst_13 {dimension_numbers = #tpu.dot_dimension_numbers<[1], [0], [0], [1], [0, 0, 1, 1], [], []>} : vector<16x32xbf16>, vector<32x128xbf16>, vector<16x128xf32> -> vector<16x128xf32>
    %15 = vector.broadcast %1 : vector<1x128xf32> to vector<16x128xf32>
    %16 = arith.addf %14, %15 : vector<16x128xf32>
    %c0_i32 = arith.constant 0 : i32
    %17 = arith.cmpi sgt, %arg1, %c0_i32 : i32
    %18 = arith.extui %17 : i1 to i32
    %19 = arith.sitofp %18 : i32 to f32
    %20 = vector.broadcast %19 : f32 to vector<16x128xf32>
    %21 = arith.mulf %16, %20 : vector<16x128xf32>
    %22 = vector.shape_cast %21 : vector<16x128xf32> to vector<1x16x128xf32>
    %c0_14 = arith.constant 0 : index
    %c1_15 = arith.constant 1 : index
    %c0_16 = arith.constant 0 : index
    %23 = vector.load %arg12[%c0_14, %c1_15, %c0_16] : memref<6x18x128xf32, #tpu.memory_space<vmem>>, vector<1x16x128xf32>
    tpu.vector_store %arg12[%c0_14, %c1_15, %c0_16], %22 {strides = array<i32>} : memref<6x18x128xf32, #tpu.memory_space<vmem>>, vector<1x16x128xf32>,
    %c0_17 = arith.constant 0 : index
    %c0_18 = arith.constant 0 : index
    %c0_19 = arith.constant 0 : index
    %c0_20 = arith.constant 0 : index
    %24 = vector.load %arg4[%c0_17, %c0_18, %c0_19, %c0_20] : memref<1x1x16x32xf32, #tpu.memory_space<vmem>>, vector<1x1x16x32xf32>
    %25 = vector.shape_cast %24 : vector<1x1x16x32xf32> to vector<16x32xf32>
    %26 = arith.truncf %25 : vector<16x32xf32> to vector<16x32xbf16>
    %cst_21 = arith.constant dense<0.000000e+00> : vector<16x128xf32>
    %27 = tpu.matmul %26, %0, %cst_21 {dimension_numbers = #tpu.dot_dimension_numbers<[1], [0], [0], [1], [0, 0, 1, 1], [], []>} : vector<16x32xbf16>, vector<32x128xbf16>, vector<16x128xf32> -> vector<16x128xf32>
    %28 = vector.broadcast %1 : vector<1x128xf32> to vector<16x128xf32>
    %29 = arith.addf %27, %28 : vector<16x128xf32>
    %c3_i32 = arith.constant 3 : i32
    %30 = arith.cmpi slt, %arg1, %c3_i32 : i32
    %31 = arith.extui %30 : i1 to i32
    %32 = arith.sitofp %31 : i32 to f32
    %33 = vector.broadcast %32 : f32 to vector<16x128xf32>
    %34 = arith.mulf %29, %33 : vector<16x128xf32>
    %35 = vector.shape_cast %34 : vector<16x128xf32> to vector<1x16x128xf32>
    %c5 = arith.constant 5 : index
    %c1_22 = arith.constant 1 : index
    %c0_23 = arith.constant 0 : index
    %36 = vector.load %arg12[%c5, %c1_22, %c0_23] : memref<6x18x128xf32, #tpu.memory_space<vmem>>, vector<1x16x128xf32>
    tpu.vector_store %arg12[%c5, %c1_22, %c0_23], %35 {strides = array<i32>} : memref<6x18x128xf32, #tpu.memory_space<vmem>>, vector<1x16x128xf32>,
    %cst_24 = arith.constant 0.000000e+00 : f32
    %37 = vector.broadcast %cst_24 : f32 to vector<6x1x128xf32>
    %c0_25 = arith.constant 0 : index
    %c0_26 = arith.constant 0 : index
    %c0_27 = arith.constant 0 : index
    %38 = vector.load %arg12[%c0_25, %c0_26, %c0_27] : memref<6x18x128xf32, #tpu.memory_space<vmem>>, vector<6x1x128xf32>
    tpu.vector_store %arg12[%c0_25, %c0_26, %c0_27], %37 {strides = array<i32>} : memref<6x18x128xf32, #tpu.memory_space<vmem>>, vector<6x1x128xf32>,
    %c0_28 = arith.constant 0 : index
    %c17 = arith.constant 17 : index
    %c0_29 = arith.constant 0 : index
    %39 = vector.load %arg12[%c0_28, %c17, %c0_29] : memref<6x18x128xf32, #tpu.memory_space<vmem>>, vector<6x1x128xf32>
    tpu.vector_store %arg12[%c0_28, %c17, %c0_29], %37 {strides = array<i32>} : memref<6x18x128xf32, #tpu.memory_space<vmem>>, vector<6x1x128xf32>,
    %c0_30 = arith.constant 0 : index
    %c0_31 = arith.constant 0 : index
    %40 = vector.load %arg7[%c0_30, %c0_31] : memref<9x128xbf16, #tpu.memory_space<vmem>>, vector<9x128xbf16>
    %c0_32 = arith.constant 0 : index
    %c0_33 = arith.constant 0 : index
    %41 = vector.load %arg8[%c0_32, %c0_33] : memref<1x128xbf16, #tpu.memory_space<vmem>>, vector<1x128xbf16>
    %c0_34 = arith.constant 0 : index
    %c0_35 = arith.constant 0 : index
    %c0_36 = arith.constant 0 : index
    %42 = vector.load %arg12[%c0_34, %c0_35, %c0_36] : memref<6x18x128xf32, #tpu.memory_space<vmem>>, vector<6x16x128xf32>
    %43 = arith.truncf %42 : vector<6x16x128xf32> to vector<6x16x128xbf16>
    %44 = vector.extract_strided_slice %43 {offsets = [0, 0, 0], sizes = [4, 16, 128], strides = [1, 1, 1]} : vector<6x16x128xbf16> to vector<4x16x128xbf16>
    %45 = vector.extract_strided_slice %40 {offsets = [0, 0], sizes = [1, 128], strides = [1, 1]} : vector<9x128xbf16> to vector<1x128xbf16>
    %46 = vector.shape_cast %45 : vector<1x128xbf16> to vector<128xbf16>
    %47 = vector.shape_cast %46 : vector<128xbf16> to vector<1x1x128xbf16>
    %48 = vector.broadcast %47 : vector<1x1x128xbf16> to vector<4x16x128xbf16>
    %49 = arith.mulf %44, %48 : vector<4x16x128xbf16>
    %50 = vector.extract_strided_slice %43 {offsets = [1, 0, 0], sizes = [4, 16, 128], strides = [1, 1, 1]} : vector<6x16x128xbf16> to vector<4x16x128xbf16>
    %51 = vector.extract_strided_slice %40 {offsets = [3, 0], sizes = [1, 128], strides = [1, 1]} : vector<9x128xbf16> to vector<1x128xbf16>
    %52 = vector.shape_cast %51 : vector<1x128xbf16> to vector<128xbf16>
    %53 = vector.shape_cast %52 : vector<128xbf16> to vector<1x1x128xbf16>
    %54 = vector.broadcast %53 : vector<1x1x128xbf16> to vector<4x16x128xbf16>
    %55 = arith.mulf %50, %54 : vector<4x16x128xbf16>
    %56 = arith.addf %49, %55 : vector<4x16x128xbf16>
    %57 = vector.extract_strided_slice %43 {offsets = [2, 0, 0], sizes = [4, 16, 128], strides = [1, 1, 1]} : vector<6x16x128xbf16> to vector<4x16x128xbf16>
    %58 = vector.extract_strided_slice %40 {offsets = [6, 0], sizes = [1, 128], strides = [1, 1]} : vector<9x128xbf16> to vector<1x128xbf16>
    %59 = vector.shape_cast %58 : vector<1x128xbf16> to vector<128xbf16>
    %60 = vector.shape_cast %59 : vector<128xbf16> to vector<1x1x128xbf16>
    %61 = vector.broadcast %60 : vector<1x1x128xbf16> to vector<4x16x128xbf16>
    %62 = arith.mulf %57, %61 : vector<4x16x128xbf16>
    %63 = arith.addf %56, %62 : vector<4x16x128xbf16>
    %c0_37 = arith.constant 0 : index
    %c1_38 = arith.constant 1 : index
    %c0_39 = arith.constant 0 : index
    %64 = vector.load %arg12[%c0_37, %c1_38, %c0_39] : memref<6x18x128xf32, #tpu.memory_space<vmem>>, vector<6x16x128xf32>
    %65 = arith.truncf %64 : vector<6x16x128xf32> to vector<6x16x128xbf16>
    %66 = vector.extract_strided_slice %65 {offsets = [0, 0, 0], sizes = [4, 16, 128], strides = [1, 1, 1]} : vector<6x16x128xbf16> to vector<4x16x128xbf16>
    %67 = vector.extract_strided_slice %40 {offsets = [1, 0], sizes = [1, 128], strides = [1, 1]} : vector<9x128xbf16> to vector<1x128xbf16>
    %68 = vector.shape_cast %67 : vector<1x128xbf16> to vector<128xbf16>
    %69 = vector.shape_cast %68 : vector<128xbf16> to vector<1x1x128xbf16>
    %70 = vector.broadcast %69 : vector<1x1x128xbf16> to vector<4x16x128xbf16>
    %71 = arith.mulf %66, %70 : vector<4x16x128xbf16>
    %72 = arith.addf %63, %71 : vector<4x16x128xbf16>
    %73 = vector.extract_strided_slice %65 {offsets = [1, 0, 0], sizes = [4, 16, 128], strides = [1, 1, 1]} : vector<6x16x128xbf16> to vector<4x16x128xbf16>
    %74 = vector.extract_strided_slice %40 {offsets = [4, 0], sizes = [1, 128], strides = [1, 1]} : vector<9x128xbf16> to vector<1x128xbf16>
    %75 = vector.shape_cast %74 : vector<1x128xbf16> to vector<128xbf16>
    %76 = vector.shape_cast %75 : vector<128xbf16> to vector<1x1x128xbf16>
    %77 = vector.broadcast %76 : vector<1x1x128xbf16> to vector<4x16x128xbf16>
    %78 = arith.mulf %73, %77 : vector<4x16x128xbf16>
    %79 = arith.addf %72, %78 : vector<4x16x128xbf16>
    %80 = vector.extract_strided_slice %65 {offsets = [2, 0, 0], sizes = [4, 16, 128], strides = [1, 1, 1]} : vector<6x16x128xbf16> to vector<4x16x128xbf16>
    %81 = vector.extract_strided_slice %40 {offsets = [7, 0], sizes = [1, 128], strides = [1, 1]} : vector<9x128xbf16> to vector<1x128xbf16>
    %82 = vector.shape_cast %81 : vector<1x128xbf16> to vector<128xbf16>
    %83 = vector.shape_cast %82 : vector<128xbf16> to vector<1x1x128xbf16>
    %84 = vector.broadcast %83 : vector<1x1x128xbf16> to vector<4x16x128xbf16>
    %85 = arith.mulf %80, %84 : vector<4x16x128xbf16>
    %86 = arith.addf %79, %85 : vector<4x16x128xbf16>
    %c0_40 = arith.constant 0 : index
    %c2 = arith.constant 2 : index
    %c0_41 = arith.constant 0 : index
    %87 = vector.load %arg12[%c0_40, %c2, %c0_41] : memref<6x18x128xf32, #tpu.memory_space<vmem>>, vector<6x16x128xf32>
    %88 = arith.truncf %87 : vector<6x16x128xf32> to vector<6x16x128xbf16>
    %89 = vector.extract_strided_slice %88 {offsets = [0, 0, 0], sizes = [4, 16, 128], strides = [1, 1, 1]} : vector<6x16x128xbf16> to vector<4x16x128xbf16>
    %90 = vector.extract_strided_slice %40 {offsets = [2, 0], sizes = [1, 128], strides = [1, 1]} : vector<9x128xbf16> to vector<1x128xbf16>
    %91 = vector.shape_cast %90 : vector<1x128xbf16> to vector<128xbf16>
    %92 = vector.shape_cast %91 : vector<128xbf16> to vector<1x1x128xbf16>
    %93 = vector.broadcast %92 : vector<1x1x128xbf16> to vector<4x16x128xbf16>
    %94 = arith.mulf %89, %93 : vector<4x16x128xbf16>
    %95 = arith.addf %86, %94 : vector<4x16x128xbf16>
    %96 = vector.extract_strided_slice %88 {offsets = [1, 0, 0], sizes = [4, 16, 128], strides = [1, 1, 1]} : vector<6x16x128xbf16> to vector<4x16x128xbf16>
    %97 = vector.extract_strided_slice %40 {offsets = [5, 0], sizes = [1, 128], strides = [1, 1]} : vector<9x128xbf16> to vector<1x128xbf16>
    %98 = vector.shape_cast %97 : vector<1x128xbf16> to vector<128xbf16>
    %99 = vector.shape_cast %98 : vector<128xbf16> to vector<1x1x128xbf16>
    %100 = vector.broadcast %99 : vector<1x1x128xbf16> to vector<4x16x128xbf16>
    %101 = arith.mulf %96, %100 : vector<4x16x128xbf16>
    %102 = arith.addf %95, %101 : vector<4x16x128xbf16>
    %103 = vector.extract_strided_slice %88 {offsets = [2, 0, 0], sizes = [4, 16, 128], strides = [1, 1, 1]} : vector<6x16x128xbf16> to vector<4x16x128xbf16>
    %104 = vector.extract_strided_slice %40 {offsets = [8, 0], sizes = [1, 128], strides = [1, 1]} : vector<9x128xbf16> to vector<1x128xbf16>
    %105 = vector.shape_cast %104 : vector<1x128xbf16> to vector<128xbf16>
    %106 = vector.shape_cast %105 : vector<128xbf16> to vector<1x1x128xbf16>
    %107 = vector.broadcast %106 : vector<1x1x128xbf16> to vector<4x16x128xbf16>
    %108 = arith.mulf %103, %107 : vector<4x16x128xbf16>
    %109 = arith.addf %102, %108 : vector<4x16x128xbf16>
    %110 = vector.shape_cast %41 : vector<1x128xbf16> to vector<1x1x128xbf16>
    %111 = vector.broadcast %110 : vector<1x1x128xbf16> to vector<4x16x128xbf16>
    %112 = arith.addf %109, %111 : vector<4x16x128xbf16>
    %113 = arith.mulf %112, %112 : vector<4x16x128xbf16>
    %114 = arith.mulf %112, %113 : vector<4x16x128xbf16>
    %cst_42 = arith.constant 4.467770e-02 : bf16
    %115 = vector.broadcast %cst_42 : bf16 to vector<4x16x128xbf16>
    %116 = arith.mulf %115, %114 : vector<4x16x128xbf16>
    %117 = arith.addf %112, %116 : vector<4x16x128xbf16>
    %cst_43 = arith.constant 7.968750e-01 : bf16
    %118 = vector.broadcast %cst_43 : bf16 to vector<4x16x128xbf16>
    %119 = arith.mulf %118, %117 : vector<4x16x128xbf16>
    %120 = math.tanh %119 : vector<4x16x128xbf16>
    %cst_44 = arith.constant 1.000000e+00 : bf16
    %121 = vector.broadcast %cst_44 : bf16 to vector<4x16x128xbf16>
    %122 = arith.addf %121, %120 : vector<4x16x128xbf16>
    %cst_45 = arith.constant 5.000000e-01 : bf16
    %123 = vector.broadcast %cst_45 : bf16 to vector<4x16x128xbf16>
    %124 = arith.mulf %123, %122 : vector<4x16x128xbf16>
    %125 = arith.mulf %112, %124 : vector<4x16x128xbf16>
    %126 = vector.shape_cast %125 : vector<4x16x128xbf16> to vector<64x128xbf16>
    %c0_46 = arith.constant 0 : index
    %c0_47 = arith.constant 0 : index
    %127 = vector.load %arg9[%c0_46, %c0_47] : memref<128x128xbf16, #tpu.memory_space<vmem>>, vector<128x128xbf16>
    %cst_48 = arith.constant dense<0.000000e+00> : vector<64x128xf32>
    %128 = tpu.matmul %126, %127, %cst_48 {dimension_numbers = #tpu.dot_dimension_numbers<[1], [0], [0], [1], [0, 0, 1, 1], [], []>} : vector<64x128xbf16>, vector<128x128xbf16>, vector<64x128xf32> -> vector<64x128xf32>
    %c0_49 = arith.constant 0 : index
    %c0_50 = arith.constant 0 : index
    %129 = vector.load %arg10[%c0_49, %c0_50] : memref<1x128xf32, #tpu.memory_space<vmem>>, vector<1x128xf32>
    %130 = vector.broadcast %129 : vector<1x128xf32> to vector<64x128xf32>
    %131 = arith.addf %128, %130 : vector<64x128xf32>
    %132 = vector.shape_cast %131 : vector<64x128xf32> to vector<4x16x128xf32>
    %c0_51 = arith.constant 0 : index
    %c0_52 = arith.constant 0 : index
    %c0_53 = arith.constant 0 : index
    %c0_54 = arith.constant 0 : index
    %133 = vector.load %arg11[%c0_51, %c0_52, %c0_53, %c0_54] : memref<1x4x16x128xf32, #tpu.memory_space<vmem>>, vector<1x4x16x128xf32>
    %134 = vector.shape_cast %133 : vector<1x4x16x128xf32> to vector<4x16x128xf32>
    %135 = vector.shape_cast %132 : vector<4x16x128xf32> to vector<1x4x16x128xf32>
    tpu.vector_store %arg11[%c0_51, %c0_52, %c0_53, %c0_54], %135 {strides = array<i32>} : memref<1x4x16x128xf32, #tpu.memory_space<vmem>>, vector<1x4x16x128xf32>,
    return
  }
  func.func @transform_0(%arg0: i32, %arg1: i32) -> (i32, i32, i32, i32) {
    %c0_i32 = arith.constant 0 : i32
    %c0_i32_0 = arith.constant 0 : i32
    %c0_i32_1 = arith.constant 0 : i32
    return %arg0, %arg1, %c0_i32, %c0_i32_0 : i32, i32, i32, i32
  }
  func.func @transform_1(%arg0: i32, %arg1: i32) -> (i32, i32, i32, i32) {
    %c4_i32 = arith.constant 4 : i32
    %0 = arith.muli %arg1, %c4_i32 : i32
    %c1_i32 = arith.constant 1 : i32
    %1 = arith.subi %0, %c1_i32 : i32
    %c0_i32 = arith.constant 0 : i32
    %2 = arith.maxsi %1, %c0_i32 : i32
    %c0_i32_0 = arith.constant 0 : i32
    %c0_i32_1 = arith.constant 0 : i32
    %c0_i32_2 = arith.constant 0 : i32
    return %arg0, %2, %c0_i32_0, %c0_i32_1 : i32, i32, i32, i32
  }
  func.func @transform_2(%arg0: i32, %arg1: i32) -> (i32, i32, i32, i32) {
    %c4_i32 = arith.constant 4 : i32
    %0 = arith.muli %arg1, %c4_i32 : i32
    %c4_i32_0 = arith.constant 4 : i32
    %1 = arith.addi %0, %c4_i32_0 : i32
    %c15_i32 = arith.constant 15 : i32
    %2 = arith.minsi %1, %c15_i32 : i32
    %c0_i32 = arith.constant 0 : i32
    %c0_i32_1 = arith.constant 0 : i32
    %c0_i32_2 = arith.constant 0 : i32
    return %arg0, %2, %c0_i32, %c0_i32_1 : i32, i32, i32, i32
  }
  func.func @transform_3(%arg0: i32, %arg1: i32) -> (i32, i32) {
    %c0_i32 = arith.constant 0 : i32
    %c0_i32_0 = arith.constant 0 : i32
    %c0_i32_1 = arith.constant 0 : i32
    return %c0_i32, %c0_i32_0 : i32, i32
  }
  func.func @transform_4(%arg0: i32, %arg1: i32) -> (i32, i32) {
    %c0_i32 = arith.constant 0 : i32
    %c0_i32_0 = arith.constant 0 : i32
    %c0_i32_1 = arith.constant 0 : i32
    return %c0_i32, %c0_i32_0 : i32, i32
  }
  func.func @transform_5(%arg0: i32, %arg1: i32) -> (i32, i32) {
    %c0_i32 = arith.constant 0 : i32
    %c0_i32_0 = arith.constant 0 : i32
    %c0_i32_1 = arith.constant 0 : i32
    return %c0_i32, %c0_i32_0 : i32, i32
  }
  func.func @transform_6(%arg0: i32, %arg1: i32) -> (i32, i32) {
    %c0_i32 = arith.constant 0 : i32
    %c0_i32_0 = arith.constant 0 : i32
    %c0_i32_1 = arith.constant 0 : i32
    return %c0_i32, %c0_i32_0 : i32, i32
  }
  func.func @transform_7(%arg0: i32, %arg1: i32) -> (i32, i32) {
    %c0_i32 = arith.constant 0 : i32
    %c0_i32_0 = arith.constant 0 : i32
    %c0_i32_1 = arith.constant 0 : i32
    return %c0_i32, %c0_i32_0 : i32, i32
  }
  func.func @transform_8(%arg0: i32, %arg1: i32) -> (i32, i32) {
    %c0_i32 = arith.constant 0 : i32
    %c0_i32_0 = arith.constant 0 : i32
    %c0_i32_1 = arith.constant 0 : i32
    return %c0_i32, %c0_i32_0 : i32, i32
  }
  func.func @transform_9(%arg0: i32, %arg1: i32) -> (i32, i32, i32, i32) {
    %c0_i32 = arith.constant 0 : i32
    %c0_i32_0 = arith.constant 0 : i32
    %c0_i32_1 = arith.constant 0 : i32
    return %arg0, %arg1, %c0_i32, %c0_i32_0 : i32, i32, i32, i32
  }
}

</mosaic_0001>

<bundles_post_ra>
// kernel: tpu_custom_call.1
= control target key start
LH: loop header
LB: loop body
LE: loop exit
PB: predicated region body
PF: predicated region fallthrough
CT: control target
= control target key end

     0   :  { %s2743_s0 = inlined_call_operand.hbm [shape: f32[2,16,16,32], index: 0, kind: input, shape index: {}]   ;;  %s2744_s1 = inlined_call_operand.hbm [shape: f32[2,16,16,32], index: 1, kind: input, shape index: {}]   ;;  %s2745_s2 = inlined_call_operand.hbm [shape: f32[2,16,16,32], index: 2, kind: input, shape index: {}]   ;;  %s2746_s3 = inlined_call_operand.hbm [shape: bf16[32,128], index: 3, kind: input, shape index: {}]   ;;  %s2747_s4 = inlined_call_operand.vmem [shape: f32[1,128], index: 4, kind: input, shape index: {}]   ;;  %s2748_s5 = inlined_call_operand.vmem [shape: bf16[9,128], index: 5, kind: input, shape index: {}]   ;;  %s2749_s6 = inlined_call_operand.vmem [shape: bf16[1,128], index: 6, kind: input, shape index: {}]   ;;  %s2750_s7 = inlined_call_operand.hbm [shape: bf16[128,128], index: 7, kind: input, shape index: {}]   ;;  %s2751_s8 = inlined_call_operand.vmem [shape: f32[1,128], index: 8, kind: input, shape index: {}]   ;;  %s2752_s9 = inlined_call_operand.hbm [shape: f32[2,16,16,128], index: 9, kind: output, shape index: {}]  }
   0x1   :  { %2784 = sst [smem:[#allocation32_spill]] %s2743_s0 }
   0x2   :  { %2785 = sst [smem:[#allocation33_spill]] %s2744_s1 }
   0x3   :  { %2786 = sst [smem:[#allocation34_spill]] %s2745_s2 }
   0x4   :  { %2787 = sst [smem:[#allocation35_spill]] %s2746_s3 }
   0x5   :  { %2788 = sst [smem:[#allocation36_spill]] %s2747_s4 }
   0x6   :  { %2789 = sst [smem:[#allocation37_spill]] %s2748_s5 }
   0x7   :  { %2790 = sst [smem:[#allocation38_spill]] %s2749_s6 }
   0x8   :  { %2791 = sst [smem:[#allocation39_spill]] %s2750_s7 }
   0x9   :  { %2792 = sst [smem:[#allocation40_spill]] %s2751_s8 }
   0xa   :  { %2793 = sst [smem:[#allocation41_spill]] %s2752_s9 }
   0xb   :  { %14 = vsyncpa [#allocation4], 0 }
   0xc   :  { %16 = vsyncpa [#allocation4 + $0x1], 0 }
   0xd   :  { %17 = vsyncpa [#allocation7], 0 }
   0xe   :  { %19 = vsyncpa [#allocation7 + $0x1], 0 }
   0xf   :  { %20 = vsyncpa [#allocation10], 0 }
  0x10   :  { %21 = vsyncpa [#allocation5], 0 }
  0x11   :  { %23 = vsyncpa [#allocation5 + $0x1], 0  ;;  %s1995_s30 = smov 0   ;;  %s1997_s10 = smov 0  }
  0x12   :  { %s1999_s11 = smov 0   ;;  %s2001_s12 = smov 0  }
  0x13   :  { %s2003_s13 = smov 0   ;;  %s2005_s14 = smov 0  }
  0x14   :  { %s2007_s15 = smov 0   ;;  %s2009_s16 = smov 0  }
  0x15   :  { %s2011_s17 = smov 0   ;;  %s2013_s18 = smov 0  }
  0x16   :  { %s2015_s19 = smov 0   ;;  %s2017_s20 = smov 0  }
  0x17   :  { %s2019_s21 = smov 0   ;;  %s2021_s22 = smov 0  }
  0x18 LB: > { %2794 = sst [smem:[#allocation18_spill]] %s1877_s30  ;;  %s2066_s23 = sadd.s32 4294967295, %s1929_s22   ;;  %s1929_s22 = sphi %s2021_s22, %s29_s22   ;;  %s1925_s21 = sphi %s2019_s21, %s2876_s21   ;;  %s1921_s20 = sphi %s2017_s20, %s2886_s20   ;;  %s1917_s19 = sphi %s2015_s19, %s2885_s19   ;;  %s1913_s18 = sphi %s2013_s18, %s2884_s18   ;;  %s1909_s17 = sphi %s2011_s17, %s2883_s17   ;;  %s1905_s16 = sphi %s2009_s16, %s2882_s16   ;;  %s1901_s15 = sphi %s2007_s15, %s2881_s15   ;;  %s1897_s14 = sphi %s2005_s14, %s2880_s14   ;;  %s1893_s13 = sphi %s2003_s13, %s2879_s13   ;;  %s1889_s12 = sphi %s2001_s12, %s2878_s12   ;;  %s1885_s11 = sphi %s1999_s11, %s2877_s11   ;;  %s1881_s10 = sphi %s1997_s10, %s2870_s10   ;;  %s1877_s30 = sphi %s1995_s30, %s2869_s30  }
  0x19   : > { %2795 = sst [smem:[#allocation19_spill]] %s1881_s10  ;;  %p1312_p0 = scmp.ge.s32.totalorder %s1929_s22, 1 }
  0x1a   : > { %2796 = sst [smem:[#allocation20_spill]] %s1885_s11  ;;  %p2754_p1 = scmp.eq.s32.totalorder %s2066_s23, 0 }
  0x1b   : > { %2797 = sst [smem:[#allocation21_spill]] %s1893_s13  ;;  %p300_p3 = scmp.lt.s32.totalorder %s1929_s22, 9 }
  0x1c   : > { %2798 = sst [smem:[#allocation22_spill]] %s1913_s18  ;;  %s1931_s25 = smov [#allocation9]  }
  0x1d   : > { %2799 = sst [smem:[#allocation23_spill]] %s1917_s19  ;;  %p2072_p4 = pnand %p1312_p0, %p300_p3 }
  0x1e   : > { %2800 = sst [smem:[#allocation24_spill]] %s1921_s20  ;;  %s312_s26 = sshll.u32 %s1931_s25, 4  ;;  %s313_s26 = int_to_ptr.vmem [resolvable:$true] %s312_s26 }
  0x1f   : > { %2801 = sst [smem:[#allocation25_spill]] %s1925_s21  ;;  %p1458_p5 = pneg %p2072_p4 }
  0x20   : > { %s2802_s24 = scalar_select %p2072_p4, 1, 0 }
  0x21   : > { %p2080_p6 = pnand %p1458_p5, %p2754_p1  ;;  %s2805_s3 = sld [smem:[#allocation35_spill]] }
  0x22   : > { %2803 = sst [smem:[#allocation26_spill]] %s2802_s24 }
  0x23   : > { %p2772_p8 = pneg %p2080_p6 }
  0x27   : > { %s1625_s9 = scalar_lea.hbm %s2805_s3, 256 }
  0x28   : > { %p1626_p7 = scmp.ne.s32.totalorder %s2805_s3, %s1625_s9  ;;  %p1632_p11 = scmp.lt.u32.totalorder %s1625_s9, %s2805_s3 }
  0x2a   : > { %p1628_p9 = pnand %p2772_p8, %p1626_p7 }
  0x2c   : > { %p1629_p10 = pneg %p1628_p9 }
  0x2e   : > { %p1634_p12 = pnand %p1632_p11, %p1629_p10 }
  0x30   : > { %1637 = shalt.err (!%p1634_p12)
}
  0x31   : > { %s1638_s28 = scalar_lea.vmem %s313_s26, 256  ;;  %p1646_p5 = scmp.lt.s32.totalorder %s313_s26, %s313_s26 }
  0x32   : > { %p1639_p13 = scmp.ne.s32.totalorder %s313_s26, %s1638_s28  ;;  %p1647_p2 = scmp.lt.s32.totalorder %s1638_s28, %s1638_s28 }
  0x34   : > { %p1641_p0 = pnand %p1639_p13, %p2772_p8  ;;  %p1648_p1 = por %p1647_p2, %p1646_p5 }
  0x36   : > { %p1642_p3 = pneg %p1641_p0 }
  0x38   : > { %p1649_p4 = pnand %p1648_p1, %p1642_p3 }
  0x3a   : > { %1652 = shalt.err (!%p1649_p4)
}
  0x3b   : > { %s2758_s8 = smov 64   ;;  %s2759_s6 = smov 4  }
  0x3c   : > { %1461 = dma.hbm_to_vmem [thread:$0]  (!%p2080_p6), %s2805_s3, 256, %s313_s26, [#allocation10], %s2758_s8, %s2758_s8, %s2759_s6  }
  0x3d   : > { %s38_s29 = sadd.s32 1, %s1921_s20  ;;  %s41_s25 = sadd.s32 1, %s1925_s21 }
  0x3e   : > { %p39_p1 = scmp.ge.s32.totalorder %s38_s29, 4  ;;  %p2771_p2 = scmp.eq.s32.totalorder %s1929_s22, 0 }
  0x3f   : > { %s1306_s28 = sshll.u32 %s1921_s20, 2  ;;  %s86_s5 = sadd.s32 1, %s1897_s14 }
  0x40   : > { %s2888_s29 = smov (%p39_p1, %s38_s29), 0  ;;  %s2890_s25 = smov (!%p39_p1, %s41_s25), %s1925_s21 }
  0x41   : > { %2806 = sst [smem:[#allocation27_spill]] %s2888_s29  ;;  %s46_s4 = ssub.s32 %s1921_s20, %s2888_s29 }
  0x42   : > { %s1307_s18 = sadd.s32 4294967295, %s1306_s28  ;;  %p43_p4 = scmp.ge.s32.totalorder %s2890_s25, 2 }
  0x43   : > { %p75_p7 = scmp.gt.s32.totalorder %s1307_s18, 0  ;;  %s1308_s26 = sshll.u32 %s2888_s29, 2 }
  0x44   : > { %p93_p9 = scmp.ne.s32.totalorder %s1897_s14, %s1893_s13  ;;  %s2892_s25 = smov (%p43_p4, %s2890_s25), 0 }
  0x45   : > { %2807 = sst [smem:[#allocation28_spill]] %s2892_s25  ;;  %s2894_s18 = smov (!%p75_p7, %s1307_s18), 0 }
  0x46   : > { %s2126_s9 = ssub.s32 %s1925_s21, %s2892_s25  ;;  %s1309_s19 = sadd.s32 4294967295, %s1308_s26 }
  0x47   : > { %2808 = sst [smem:[#allocation29_spill]] %s2126_s9  ;;  %s2129_s8 = sor.u32 %s46_s4, %s2126_s9 }
  0x48   : > { %p79_p10 = scmp.gt.s32.totalorder %s1309_s19, 0  ;;  %p2134_p12 = por %p93_p9, %p2771_p2 }
  0x49   : > { %p99_p13 = scmp.ne.s32.totalorder %s1893_s13, %s1889_s12  ;;  %s2140_s3 = sadd.s32 4, %s1306_s28 }
  0x4a   : > { %s2896_s19 = smov (!%p79_p10, %s1309_s19), 0  ;;  %p2810_p3 = scmp.eq.s32.totalorder %s2066_s23, 0 }
  0x4b   : > { %s82_s25 = ssub.s32 %s2894_s18, %s2896_s19  ;;  %s2150_s24 = sadd.s32 4, %s1308_s26 }
  0x4c   : > { %s83_s4 = sor.u32 %s82_s25, %s2126_s9  ;;  %p2146_p5 = por %p99_p13, %p2810_p3 }
  0x4d   : > { %p84_p1 = scmp.eq.s32.totalorder %s83_s4, 0  ;;  %p2770_p7 = scmp.lt.s32.totalorder %s1929_s22, 8 }
  0x4e   : > { %s2811_s29 = scalar_select %p2146_p5, 1, 0 }
  0x4f   : > { %s2155_s12 = scalar_select %p84_p1, %s1897_s14, %s86_s5  }
  0x50   : > { %2812 = sst [smem:[#allocation30_spill]] %s2811_s29  ;;  %s2158_s28 = sshll.u32 %s1925_s21, 5 }
  0x51   : > { %s375_s19 = sand.u32 1, %s1929_s22   ;;  %s377_s25 = sand.u32 1, %s1897_s14  }
  0x52   : > { %s1321_s13 = sshll.u32 %s377_s25, 4  ;;  %s1324_s2 = sshll.u32 %s2894_s18, 1 }
  0x53   : > { %s389_s9 = sadd.s32 %s1324_s2, %s2158_s28  ;;  %s379_s29 = scalar_lea.vmem [#allocation6], %s1321_s13 }
  0x54   : > { %s1326_s30 = sshll.u32 %s389_s9, 7  ;;  %s392_s4 = sshll.u32 %s379_s29, 4  ;;  %s2168_s4 = int_to_ptr.vmem [resolvable:$true] %s392_s4 }
  0x55   : > { %s2813_s1 = sld [smem:[#allocation33_spill]]  ;;  %p2174_p9 = pnand %p2770_p7, %p2134_p12 }
  0x56   : > { %s1934_s2 = smov [#allocation11]  }
  0x57   : > { %s334_s13 = sshll.u32 %s1934_s2, 4  ;;  %p1655_p13 = pneg %p2174_p9  ;;  %s2178_s13 = int_to_ptr.vmem [resolvable:$true] %s334_s13 }
  0x5b   : > { %s2166_s26 = scalar_lea.hbm %s2813_s1, %s1326_s30  ;;  %s2180_s30 = scalar_lea.sflag [#allocation7], %s375_s19 }
  0x5c   : > { %s1653_s10 = scalar_lea.hbm %s2166_s26, 256  ;;  %s1658_s6 = scalar_lea.hbm %s2813_s1, 8192 }
  0x5d   : > { %p1654_p10 = scmp.ne.s32.totalorder %s2166_s26, %s1653_s10  ;;  %p1659_p12 = scmp.lt.u32.totalorder %s2166_s26, %s2813_s1 }
  0x5e   : > { %p1660_p4 = scmp.lt.u32.totalorder %s1658_s6, %s1653_s10  ;;  %p1662_p7 = scmp.lt.u32.totalorder %s1653_s10, %s2166_s26 }
  0x5f   : > { %p1656_p3 = pnand %p1655_p13, %p1654_p10 }
  0x60   : > { %p1661_p0 = por %p1660_p4, %p1659_p12 }
  0x61   : > { %p1657_p1 = pneg %p1656_p3 }
  0x62   : > { %p1663_p2 = por %p1662_p7, %p1661_p0 }
  0x64   : > { %p1664_p11 = pnand %p1663_p2, %p1657_p1 }
  0x66   : > { %1667 = shalt.err (!%p1664_p11)
}
  0x67   : > { %s1668_s19 = scalar_lea.vmem %s2168_s4, 256  ;;  %s1935_s25 = smov [#allocation6]  }
  0x68   : > { %p1669_p10 = scmp.ne.s32.totalorder %s2168_s4, %s1668_s19  ;;  %s1673_s2 = sshll.u32 %s1935_s25, 4  ;;  %s1674_s2 = int_to_ptr.vmem [resolvable:$false] %s1673_s2 }
  0x69   : > { %s1675_s11 = scalar_lea.vmem %s1674_s2, 512  ;;  %p1676_p5 = scmp.lt.s32.totalorder %s2168_s4, %s1674_s2 }
  0x6a   : > { %p1671_p3 = pnand %p1669_p10, %p1655_p13  ;;  %p1677_p4 = scmp.lt.s32.totalorder %s1675_s11, %s1668_s19 }
  0x6c   : > { %p1672_p8 = pneg %p1671_p3  ;;  %p1678_p12 = por %p1677_p4, %p1676_p5 }
  0x6e   : > { %p1679_p0 = pnand %p1678_p12, %p1672_p8 }
  0x70   : > { %1682 = shalt.err (!%p1679_p0)
}
  0x71   : > { %s2774_s10 = smov 128   ;;  %s2776_s18 = smov 8  }
  0x72   : > { %1471 = dma.hbm_to_vmem [thread:$0]  (!%p2174_p9), %s2166_s26, 256, %s2168_s4, %s2180_s30, %s2774_s10, %s2774_s10, %s2776_s18  }
  0x73   : > { %s2815_s7 = sld [smem:[#allocation39_spill]]  ;;  %p2816_p2 = pneg %p2080_p6 }
  0x79   : > { %s1683_s9 = scalar_lea.hbm %s2815_s7, 1024 }
  0x7a   : > { %p1684_p8 = scmp.ne.s32.totalorder %s2815_s7, %s1683_s9  ;;  %p1690_p7 = scmp.lt.u32.totalorder %s1683_s9, %s2815_s7 }
  0x7c   : > { %p1686_p11 = pnand %p1684_p8, %p2816_p2 }
  0x7e   : > { %p1687_p5 = pneg %p1686_p11 }
  0x80   : > { %p1692_p13 = pnand %p1690_p7, %p1687_p5 }
  0x82   : > { %1695 = shalt.err (!%p1692_p13)
}
  0x83   : > { %s1696_s4 = scalar_lea.vmem %s2178_s13, 1024  ;;  %p2817_p1 = pmov %p2816_p2 }
  0x84   : > { %p1697_p9 = scmp.ne.s32.totalorder %s2178_s13, %s1696_s4  ;;  %p1704_p4 = scmp.lt.s32.totalorder %s2178_s13, %s2178_s13 }
  0x85   : > { %p1705_p12 = scmp.lt.s32.totalorder %s1696_s4, %s1696_s4 }
  0x86   : > { %p1699_p10 = pnand %p1697_p9, %p2817_p1 }
  0x87   : > { %p1706_p0 = por %p1705_p12, %p1704_p4 }
  0x88   : > { %p1700_p3 = pneg %p1699_p10 }
  0x8a   : > { %p1707_p8 = pnand %p1706_p0, %p1700_p3 }
  0x8c   : > { %1710 = shalt.err (!%p1707_p8)
}
  0x8d   : > { %s2818_s26 = smov 4   ;;  %s2819_s5 = smov 64  }
  0x8e   : > { %1464 = dma.hbm_to_vmem [thread:$0]  (!%p2080_p6), %s2815_s7, 1024, %s2178_s13, [#allocation10], %s2819_s5, %s2819_s5, %s2818_s26  }
  0x8f   : > { %s1305_s27 = sadd.s32 4294967294, %s1929_s22   ;;  %s50_s9 = sadd.s32 1, %s1909_s17 }
  0x90   : > { %p57_p2 = scmp.ne.s32.totalorder %s1909_s17, %s1905_s16  ;;  %p2820_p11 = scmp.eq.s32.totalorder %s2129_s8, 0 }
  0x91   : > { %p2821_p5 = scmp.eq.s32.totalorder %s1929_s22, 0  ;;  %p63_p13 = scmp.ne.s32.totalorder %s1905_s16, %s1901_s15 }
  0x92   : > { %s2246_s19 = scalar_select %p2820_p11, %s1909_s17, %s50_s9  }
  0x93   : > { %p2250_p7 = por %p2821_p5, %p57_p2  ;;  %p2823_p9 = scmp.eq.s32.totalorder %s2066_s23, 7 }
  0x94   : > { %p293_p6 = scmp.eq.s32.totalorder %s1305_s27, 7  ;;  %p2826_p10 = scmp.eq.s32.totalorder %s2066_s23, 0 }
  0x95   : > { %p2258_p1 = por %p2823_p9, %p57_p2  ;;  %s351_s8 = sand.u32 1, %s1909_s17  }
  0x96   : > { %p2264_p3 = por %p2826_p10, %p63_p13  ;;  %p2269_p4 = por %p293_p6, %p63_p13 }
  0x97   : > { %s2824_s2 = scalar_select %p2258_p1, 1, 0 }
  0x98   : > { %s2828_s11 = scalar_select %p2269_p4, 1, 0 }
  0x99   : > { %2825 = sst [smem:[#allocation31_spill]] %s2824_s2  ;;  %s1316_s4 = sshll.u32 %s351_s8, 6 }
  0x9a   : > { %s1364_s26 = sshll.u32 %s1921_s20, 3  ;;  %s355_s29 = scalar_lea.vmem [#allocation3], %s1316_s4 }
  0x9b   : > { %s362_s5 = sadd.s32 %s1364_s26, %s2158_s28  ;;  %s365_s9 = sshll.u32 %s355_s29, 4  ;;  %s2280_s9 = int_to_ptr.vmem [resolvable:$true] %s365_s9 }
  0x9c   : > { %s1320_s6 = sshll.u32 %s362_s5, 7  ;;  %s2829_s0 = sld [smem:[#allocation32_spill]] }
  0x9d   : > { %p2830_p12 = scmp.lt.s32.totalorder %s1929_s22, 8  ;;  %s2290_s4 = scalar_lea.sflag [#allocation4], %s351_s8 }
  0x9f   : > { %p2286_p0 = pnand %p2830_p12, %p2250_p7 }
  0xa1   : > { %p1713_p2 = pneg %p2286_p0 }
  0xa2   : > { %s2278_s27 = scalar_lea.hbm %s2829_s0, %s1320_s6  ;;  %s1716_s25 = scalar_lea.hbm %s2829_s0, 8192 }
  0xa3   : > { %s1711_s26 = scalar_lea.hbm %s2278_s27, 1024  ;;  %p1717_p7 = scmp.lt.u32.totalorder %s2278_s27, %s2829_s0 }
  0xa4   : > { %p1712_p8 = scmp.ne.s32.totalorder %s2278_s27, %s1711_s26  ;;  %p1718_p13 = scmp.lt.u32.totalorder %s1716_s25, %s1711_s26 }
  0xa5   : > { %p1720_p6 = scmp.lt.u32.totalorder %s1711_s26, %s2278_s27 }
  0xa6   : > { %p1714_p11 = pnand %p1713_p2, %p1712_p8  ;;  %p1719_p9 = por %p1718_p13, %p1717_p7 }
  0xa8   : > { %p1715_p5 = pneg %p1714_p11  ;;  %p1721_p10 = por %p1720_p6, %p1719_p9 }
  0xaa   : > { %p1722_p12 = pnand %p1721_p10, %p1715_p5 }
  0xac   : > { %1725 = shalt.err (!%p1722_p12)
}
  0xad   : > { %s1726_s8 = scalar_lea.vmem %s2280_s9, 1024  ;;  %s1938_s29 = smov [#allocation3]  }
  0xae   : > { %p1727_p8 = scmp.ne.s32.totalorder %s2280_s9, %s1726_s8  ;;  %s1731_s10 = sshll.u32 %s1938_s29, 4  ;;  %s1732_s10 = int_to_ptr.vmem [resolvable:$false] %s1731_s10 }
  0xaf   : > { %s1733_s18 = scalar_lea.vmem %s1732_s10, 2048  ;;  %p1734_p1 = scmp.lt.s32.totalorder %s2280_s9, %s1732_s10 }
  0xb0   : > { %p1729_p11 = pnand %p1727_p8, %p1713_p2  ;;  %p1735_p7 = scmp.lt.s32.totalorder %s1733_s18, %s1726_s8 }
  0xb2   : > { %p1730_p4 = pneg %p1729_p11  ;;  %p1736_p13 = por %p1735_p7, %p1734_p1 }
  0xb4   : > { %p1737_p9 = pnand %p1736_p13, %p1730_p4 }
  0xb6   : > { %1740 = shalt.err (!%p1737_p9)
}
  0xb7   : > { %s2832_s26 = smov 8   ;;  %s2833_s25 = smov 128  }
  0xb8   : > { %s2834_s5 = sld [smem:[#allocation20_spill]]  ;;  %s2835_s6 = sld [smem:[#allocation19_spill]] }
  0xb9   : > { %s2836_s29 = sld [smem:[#allocation18_spill]]  ;;  %s2837_s8 = sld [smem:[#allocation29_spill]] }
  0xba   : > { %1468 = dma.hbm_to_vmem [thread:$0]  (!%p2286_p0), %s2278_s27, 1024, %s2280_s9, %s2290_s4, %s2833_s25, %s2833_s25, %s2832_s26  }
  0xbb   : > { %p2838_p1 = scmp.lt.s32.totalorder %s2140_s3, 15  ;;  %p2839_p4 = scmp.lt.s32.totalorder %s2150_s24, 15 }
  0xbc   : > { %p2840_p6 = scmp.eq.s32.totalorder %s1929_s22, 0  ;;  %p2842_p8 = scmp.eq.s32.totalorder %s2066_s23, 0 }
  0xbd   : > { %s2898_s3 = smov (!%p2838_p1, %s2140_s3), 15  ;;  %s2900_s24 = smov (!%p2839_p4, %s2150_s24), 15 }
  0xbe   : > { %s122_s1 = sadd.s32 1, %s2834_s5  ;;  %p129_p2 = scmp.ne.s32.totalorder %s2834_s5, %s2835_s6 }
  0xbf   : > { %s118_s10 = ssub.s32 %s2898_s3, %s2900_s24  ;;  %p135_p5 = scmp.ne.s32.totalorder %s2835_s6, %s2836_s29 }
  0xc0   : > { %s119_s18 = sor.u32 %s118_s10, %s2837_s8  ;;  %p2335_p10 = por %p129_p2, %p2840_p6 }
  0xc1   : > { %p120_p12 = scmp.eq.s32.totalorder %s119_s18, 0  ;;  %p2341_p11 = por %p135_p5, %p2842_p8 }
  0xc2   : > { %s404_s27 = sand.u32 1, %s2834_s5   ;;  %s1329_s4 = sshll.u32 %s2898_s3, 1 }
  0xc3   : > { %s2843_s9 = scalar_select %p2341_p11, 1, 0 }
  0xc4   : > { %s2902_s5 = smov (!%p120_p12, %s2834_s5), %s122_s1  ;;  %s1327_s24 = sshll.u32 %s404_s27, 4 }
  0xc5   : > { %s416_s7 = sadd.s32 %s1329_s4, %s2158_s28  ;;  %s2844_s10 = sld [smem:[#allocation34_spill]] }
  0xc6   : > { %s1331_s6 = sshll.u32 %s416_s7, 7  ;;  %s406_s18 = scalar_lea.vmem [#allocation8], %s1327_s24 }
  0xc7   : > { %s419_s20 = sshll.u32 %s406_s18, 4  ;;  %p2846_p0 = scmp.lt.s32.totalorder %s1929_s22, 8  ;;  %s2355_s20 = int_to_ptr.vmem [resolvable:$true] %s419_s20 }
  0xc9   : > { %p2361_p7 = pnand %p2846_p0, %p2335_p10 }
  0xcb   : > { %s2845_s2 = smov %s2844_s10  ;;  %s2353_s21 = scalar_lea.hbm %s2844_s10, %s1331_s6 }
  0xcc   : > { %s1741_s7 = scalar_lea.hbm %s2353_s21, 256  ;;  %p1743_p9 = pneg %p2361_p7 }
  0xcd   : > { %p1742_p13 = scmp.ne.s32.totalorder %s2353_s21, %s1741_s7  ;;  %s1746_s27 = scalar_lea.hbm %s2845_s2, 8192 }
  0xce   : > { %p1747_p2 = scmp.lt.u32.totalorder %s2353_s21, %s2845_s2  ;;  %p1748_p5 = scmp.lt.u32.totalorder %s1746_s27, %s1741_s7 }
  0xcf   : > { %p1744_p1 = pnand %p1743_p9, %p1742_p13  ;;  %p1750_p10 = scmp.lt.u32.totalorder %s1741_s7, %s2353_s21 }
  0xd0   : > { %p1749_p6 = por %p1748_p5, %p1747_p2 }
  0xd1   : > { %p1745_p4 = pneg %p1744_p1 }
  0xd2   : > { %p1751_p12 = por %p1750_p10, %p1749_p6 }
  0xd4   : > { %p1752_p8 = pnand %p1751_p12, %p1745_p4 }
  0xd6   : > { %1755 = shalt.err (!%p1752_p8)
}
  0xd7   : > { %s1756_s24 = scalar_lea.vmem %s2355_s20, 256  ;;  %s1939_s6 = smov [#allocation8]  }
  0xd8   : > { %p1757_p0 = scmp.ne.s32.totalorder %s2355_s20, %s1756_s24  ;;  %s1761_s29 = sshll.u32 %s1939_s6, 4  ;;  %s1762_s29 = int_to_ptr.vmem [resolvable:$false] %s1761_s29 }
  0xd9   : > { %s1763_s8 = scalar_lea.vmem %s1762_s29, 512  ;;  %p1764_p11 = scmp.lt.s32.totalorder %s2355_s20, %s1762_s29 }
  0xda   : > { %p1759_p13 = pnand %p1757_p0, %p1743_p9  ;;  %p1765_p2 = scmp.lt.s32.totalorder %s1763_s8, %s1756_s24 }
  0xdc   : > { %p1760_p1 = pneg %p1759_p13  ;;  %p1766_p5 = por %p1765_p2, %p1764_p11 }
  0xde   : > { %p1767_p6 = pnand %p1766_p5, %p1760_p1 }
  0xe0   : > { %1770 = shalt.err (!%p1767_p6)
}
  0xe1   : > { %1474 = dma.hbm_to_vmem [thread:$0]  (!%p2361_p7), %s2353_s21, 256, %s2355_s20, %s2180_s30, %s2833_s25, %s2833_s25, %s2832_s26  }
  0xe2   : > { %s2848_s10 = sld [smem:[#allocation26_spill]] }
  0xe8   : > { %p2849_p9 = scmp.ne.s32.totalorder %s2848_s10, 0 }
  0xe9   : > { %s2397_s18 = sand.u32 (!%p2849_p9), 1, %s1905_s16  }
  0xea   : > { %431 = sbr.rel (%p2849_p9) target bundleno = 807 (0x327), region = 56  ;;  %s1333_s7 = sshll.u32 (!%p2849_p9), %s2397_s18, 6 }
  0xeb   : > { %s434_s28 = scalar_lea.sflag (!%p2849_p9), [#allocation4], %s2397_s18  ;;  %s2403_s3 = scalar_lea.vmem (!%p2849_p9), [#allocation3], %s1333_s7 }
  0xf1   : > { %1856 = dma.done.wait (%p2264_p3), %s434_s28, 1024  }
  0xf2   : > { %1858 = vsyncadd (%p2264_p3), %s434_s28, 4294966272  ;;  %s2850_s20 = sld [smem:[#allocation21_spill]]  ;;  %s2851_s21 = sld [smem:[#allocation30_spill]] }
  0xf3   : > { %s442_s30 = sand.u32 1, %s2066_s23  }
  0xf4   : > { %s443_s1 = scalar_lea.sflag [#allocation7], %s442_s30 }
  0xf8   : > { %s444_s26 = sand.u32 1, %s2850_s20   ;;  %p2852_p11 = scmp.ne.s32.totalorder %s2851_s21, 0 }
  0xf9   : > { %s2411_s25 = sshll.u32 %s444_s26, 4 }
  0xfa   : > { %s446_s27 = scalar_lea.vmem [#allocation6], %s2411_s25 }
  0xfb   : > { %1860 = dma.done.wait (%p2852_p11), %s443_s1, 256  }
  0xfc   : > { %1862 = vsyncadd (%p2852_p11), %s443_s1, 4294967040  ;;  %s2853_s0 = sld [smem:[#allocation19_spill]]  ;;  %p2854_p3 = scmp.ne.s32.totalorder %s2843_s9, 0 }
 0x102   : > { %s453_s4 = sand.u32 1, %s2853_s0  }
 0x103   : > { %s2419_s13 = sshll.u32 %s453_s4, 4 }
 0x104   : > { %s455_s24 = scalar_lea.vmem [#allocation8], %s2419_s13 }
 0x105   : > { %1864 = dma.done.wait (%p2854_p3), %s443_s1, 256  }
 0x106   : > { %1866 = vsyncadd (%p2854_p3), %s443_s1, 4294967040  ;;  %p2855_p7 = scmp.eq.s32.totalorder %s2066_s23, 0 }
 0x108   : > { %1868 = dma.done.wait (%p2855_p7), [#allocation10], 1280   ;;  %p2856_p4 = pmov %p2855_p7 }
 0x109   : > { %v1940_v0 = vmov 0.0   ;;  %v1607_v1 = vld [vmem:[#allocation9] sm:$0xff]   ;;  %v1608_v2 = vld [vmem:[#allocation9 + $0x8] sm:$0xff]   ;;  %vm558_vm0 = vcmask 261120   ;;  %v530_v6 = vld [vmem:[%s2403_s3 + $0x10] sm:$0xff]  ;;  %vm1941_vm1 = vmmov 0   ;;  %v792_v38 = vlaneseq }
 0x10a   : > { %1870 = vsyncadd (%p2856_p4), [#allocation10], 4294966016  ;;  %756 = vst [vmem:[#allocation2] sm:$0x1] %v1940_v0  ;;  %1390 = vmatprep.subr.bf16.mxu1 %v1607_v1  ;;  %v528_v3 = vld [vmem:[%s2403_s3] sm:$0xff]  ;;  %v529_v4 = vld [vmem:[%s2403_s3 + $0x8] sm:$0xff] }
 0x10b   : > { %757 = vst [vmem:[#allocation2 + $0x18] sm:$0x1] %v1940_v0  ;;  %758 = vst [vmem:[#allocation2 + $0x30] sm:$0x1] %v1940_v0  ;;  %1391 = vmatpush3.bf16.msra.mxu1 %v1607_v1  ;;  %v536_v5 = vpack.c.bf16 %v529_v4, %v528_v3  ;;  %v531_v7 = vld [vmem:[%s2403_s3 + $0x18] sm:$0xff]  ;;  %v532_v8 = vld [vmem:[%s2403_s3 + $0x20] sm:$0xff] }
 0x10c   : > { %759 = vst [vmem:[#allocation2 + $0x48] sm:$0x1] %v1940_v0  ;;  %760 = vst [vmem:[#allocation2 + $0x60] sm:$0x1] %v1940_v0  ;;  %1392 = vmatprep.subr.bf16.mxu1 %v1608_v2  ;;  %v533_v9 = vld [vmem:[%s2403_s3 + $0x28] sm:$0xff]  ;;  %v537_v10 = vpack.c.bf16 %v531_v7, %v530_v6  ;;  %v534_v12 = vld [vmem:[%s2403_s3 + $0x30] sm:$0xff] }
 0x10d   : > { %761 = vst [vmem:[#allocation2 + $0x78] sm:$0x1] %v1940_v0  ;;  %762 = vst [vmem:[#allocation2 + $0x11] sm:$0x1] %v1940_v0  ;;  %1394 = vmatprep.mubr.msk.bf16.mxu1 %vm558_vm0, %v536_v5  ;;  %v538_v11 = vpack.c.bf16 %v533_v9, %v532_v8  ;;  %v535_v13 = vld [vmem:[%s2403_s3 + $0x38] sm:$0xff]  ;;  %v645_v15 = vld [vmem:[%s446_s27] sm:$0xff] }
 0x10e   : > { %763 = vst [vmem:[#allocation2 + $0x29] sm:$0x1] %v1940_v0  ;;  %764 = vst [vmem:[#allocation2 + $0x41] sm:$0x1] %v1940_v0  ;;  %v539_v14 = vpack.c.bf16 %v535_v13, %v534_v12  ;;  %v646_v16 = vld [vmem:[%s446_s27 + $0x8] sm:$0xff]  ;;  %v700_v18 = vld [vmem:[%s455_s24] sm:$0xff] }
 0x10f   : > { %765 = vst [vmem:[#allocation2 + $0x59] sm:$0x1] %v1940_v0  ;;  %766 = vst [vmem:[#allocation2 + $0x71] sm:$0x1] %v1940_v0  ;;  %1393 = vmatpush3.bf16.msra.mxu1 %v1608_v2  ;;  %v647_v17 = vpack.c.bf16 %v646_v16, %v645_v15  ;;  %v701_v19 = vld [vmem:[%s455_s24 + $0x8] sm:$0xff]  ;;  %v1609_v21 = vld [vmem:[#allocation11] sm:$0xff]  }
 0x110   : > { %767 = vst [vmem:[#allocation2 + $0x89] sm:$0x1] %v1940_v0  ;;  %1402 = vmatprep.subr.bf16.mxu1 %v1940_v0  ;;  %v702_v20 = vpack.c.bf16 %v701_v19, %v700_v18  ;;  %v1610_v22 = vld [vmem:[#allocation11 + $0x8] sm:$0xff]   ;;  %1418 = vmatprep.subr.bf16.mxu0 %v1609_v21  ;;  %v1611_v23 = vld [vmem:[#allocation11 + $0x10] sm:$0xff]   ;;  %v1612_v24 = vld [vmem:[#allocation11 + $0x18] sm:$0xff]   ;;  %s2857_s23 = sld [smem:[#allocation22_spill]] }
 0x111   : > { %1419 = vmatpush3.bf16.msra.mxu0 %v1609_v21  ;;  %v1613_v25 = vld [vmem:[#allocation11 + $0x20] sm:$0xff]   ;;  %v1614_v26 = vld [vmem:[#allocation11 + $0x28] sm:$0xff]   ;;  %v1615_v27 = vld [vmem:[#allocation11 + $0x30] sm:$0xff]   ;;  %s2858_s29 = sld [smem:[#allocation36_spill]]  ;;  %s2859_s28 = sld [smem:[#allocation37_spill]]  ;;  %v2472_v45 = vshrl.u32 %v792_v38, 7 }
 0x112   : > { %1395 = vmatmul.mubr.msk.bf16.vlgmr.msra.gmra.mrb[0].mxu1 %vm558_vm0, %v537_v10  ;;  %1420 = vmatprep.subr.bf16.mxu0 %v1610_v22  ;;  %v1616_v28 = vld [vmem:[#allocation11 + $0x38] sm:$0xff]   ;;  %s2860_s0 = sld [smem:[#allocation38_spill]]  ;;  %s2861_s4 = sld [smem:[#allocation23_spill]] }
 0x113   : > { %1403 = vmatpush3.bf16.msra.mxu1 %v1607_v1  ;;  %1398 = vmatprep.mubr.msk.bf16.mxu1 %vm558_vm0, %v538_v11  ;;  %v805_v52 = vsub.s32 1, %v2472_v45  ;;  %v2481_v56 = vsub.s32 0, %v2472_v45  ;;  %v859_v10 = vsub.s32 2, %v2472_v45  ;;  %v817_v11 = vsub.s32 3, %v2472_v45  ;;  %s2862_s9 = sld [smem:[#allocation40_spill]]  ;;  %s507_s6 = scalar_lea.vmem [#allocation12], %s1333_s7 }
 0x114   : > { %1404 = vmatprep.subr.bf16.mxu1 %v1940_v0  ;;  %s1130_s1 = scalar_lea.sflag [#allocation5], %s2397_s18 }
 0x115   : > { %1421 = vmatpush3.bf16.msra.mxu0 %v1610_v22 }
 0x116   : > { %1422 = vmatprep.subr.bf16.mxu0 %v1611_v23  ;;  %p692_p10 = scmp.gt.s32.totalorder %s2857_s23, 0  ;;  %p747_p12 = scmp.lt.s32.totalorder %s2857_s23, 3 }
 0x117   : > { %1405 = vmatpush3.bf16.msra.mxu1 %v1608_v2  ;;  %v2455_v29 = vld [vmem:[%s2858_s29] ss:$0 sm:$0xff]  ;;  %v769_v38 = vld [vmem:[%s2859_s28 + $0x4] sm:$0x1]  ;;  %s1365_s29 = sshll.u32 %s2857_s23, 3 }
 0x118   : > { %1410 = vmatprep.subr.bf16.mxu1 %v1940_v0  ;;  %v768_v41 = vld [vmem:[%s2859_s28] sm:$0xf]  ;;  %s2469_s3 = scalar_select %p692_p10, 1, 0 }
 0x119   : > { %1423 = vmatpush3.bf16.msra.mxu0 %v1611_v23  ;;  %v800_v48 = vshrl.u32 %v768_v41, 16  ;;  %v790_v55 = vpack.i.b16 %v768_v41, %v768_v41  ;;  %s2491_s21 = scalar_select %p747_p12, 1, 0 }
 0x11a   : > { %1399 = vmatmul.mubr.msk.bf16.gmra.mrb[4].mxu1 %vm558_vm0, %v539_v14  ;;  %1424 = vmatprep.subr.bf16.mxu0 %v1612_v24  ;;  %s694_s20 = scvt.s32.f32 %s2469_s3  ;;  %s1360_s8 = sshll.u32 %s2861_s4, 5 }
 0x11b   : > { %1406 = vmatprep.mubr.msk.bf16.mxu1 %vm1941_vm1, %v1940_v0  ;;  %v2485_v58 = vpack.i.b16 %v800_v48, %v800_v48  ;;  %v2494_v62 = vrot.slane %v790_v55, %v2481_v56  ;;  %s749_s30 = scvt.s32.f32 %s2491_s21  ;;  %v2519_v19 = vrot.slane %v790_v55, %v817_v11  ;;  %s1143_s10 = sadd.s32 %s1365_s29, %s1360_s8 }
 0x11c   : > { %s1146_s3 = sshll.u32 %s507_s6, 4  ;;  %s1361_s21 = sshll.u32 %s1143_s10, 7  ;;  %s2660_s3 = int_to_ptr.vmem [resolvable:$true] %s1146_s3 }
 0x11d   : > { %1425 = vmatpush3.bf16.msra.mxu0 %v1612_v24  ;;  %v2503_v3 = vrot.slane %v2485_v58, %v805_v52  ;;  %v750_v23 = vstv %s749_s30  ;;  %v2573_v45 = vrot.slane %v2485_v58, %v859_v10  ;;  %s2864_s30 = sld [smem:[#allocation41_spill]]  ;;  %s1771_s27 = scalar_lea.vmem %s2660_s3, 1024 }
 0x11e   : > { %1426 = vmatprep.subr.bf16.mxu0 %v1613_v25  ;;  %p1772_p8 = scmp.ne.s32.totalorder %s2660_s3, %s1771_s27 }
 0x121   : > { %1427 = vmatpush3.bf16.msra.mxu0 %v1613_v25  ;;  %v2532_v25 = vrot.slane %v790_v55, %v859_v10 }
 0x122   : > { %1407 = vmatmul.mubr.msk.bf16.vlgmr.msra.gmra.mrb[8].mxu1 %vm558_vm0, %v647_v17  ;;  %1428 = vmatprep.subr.bf16.mxu0 %v1614_v26 }
 0x123   : > { %1411 = vmatpush3.bf16.msra.mxu1 %v1607_v1  ;;  %1414 = vmatprep.mubr.msk.bf16.mxu1 %vm1941_vm1, %v1940_v0  ;;  %s2865_s26 = smov %s2864_s30  ;;  %s2665_s25 = scalar_lea.hbm %s2864_s30, %s1361_s21 }
 0x124   : > { %1412 = vmatprep.subr.bf16.mxu1 %v1940_v0  ;;  %v695_v0 = vstv %s694_s20  ;;  %s2863_s20 = sld [smem:[#allocation31_spill]] }
 0x125   : > { %1429 = vmatpush3.bf16.msra.mxu0 %v1614_v26 }
 0x126   : > { %1430 = vmatprep.subr.bf16.mxu0 %v1615_v27 }
 0x127   : > { %1413 = vmatpush3.bf16.msra.mxu1 %v1608_v2 }
 0x129   : > { %1431 = vmatpush3.bf16.msra.mxu0 %v1615_v27 }
 0x12a   : > { %1415 = vmatmul.mubr.msk.bf16.vlgmr.msra.gmra.mrb[12].mxu1 %vm558_vm0, %v702_v20  ;;  %1432 = vmatprep.subr.bf16.mxu0 %v1616_v28  ;;  %v2523_v20 = vrot.slane %v2485_v58, %v2481_v56  ;;  %p2866_p0 = scmp.ne.s32.totalorder %s2863_s20, 0 }
 0x12c   : > { %p1773_p13 = pnand %p1772_p8, %p2866_p0 }
 0x12d   : > { %1433 = vmatpush3.bf16.msra.mxu0 %v1616_v28 }
 0x12e   : > { %p1774_p1 = pneg %p1773_p13 }
 0x1e5   : > { %v1396_v30 = vpop.f32.mrb[0].mxu1 }
 0x1e6   : > { %v614_v31 = vadd.f32 %v1396_v30, %v2455_v29  ;;  %v605_v32 = vpop.f32.mrb[1].mxu1 }
 0x1e7   : > { %v606_v33 = vadd.f32 %v2455_v29, %v605_v32  ;;  %v1397_v34 = vpop.f32.mrb[2].mxu1 }
 0x1e8   : > { %639 = vst [vmem:[#allocation2 + $0x31] sm:$0xff] %v614_v31  ;;  %v617_v35 = vadd.f32 %v1397_v34, %v2455_v29  ;;  %v608_v36 = vpop.f32.mrb[3].mxu1 }
 0x1e9   : > { %637 = vst [vmem:[#allocation2 + $0x19] sm:$0xff] %v606_v33  ;;  %v609_v37 = vadd.f32 %v2455_v29, %v608_v36  ;;  %v2542_v36 = vrot.slane %v2485_v58, %v817_v11 }
 0x1ea   : > { %640 = vst [vmem:[#allocation2 + $0x39] sm:$0xff] %v617_v35  ;;  %v2462_v39 = vpack.c.bf16 %v617_v35, %v614_v31 }
 0x1eb   : > { %638 = vst [vmem:[#allocation2 + $0x21] sm:$0xff] %v609_v37  ;;  %v2464_v40 = vpack.c.bf16 %v609_v37, %v606_v33 }
 0x1ed   : > { %v1400_v42 = vpop.f32.mrb[4].mxu1  ;;  %v850_v41 = vmul.bf16 %v2523_v20, %v2464_v40 }
 0x1ee   : > { %v630_v43 = vadd.f32 %v1400_v42, %v2455_v29  ;;  %v621_v44 = vpop.f32.mrb[5].mxu1 }
 0x1ef   : > { %v622_v46 = vadd.f32 %v2455_v29, %v621_v44  ;;  %v1401_v47 = vpop.f32.mrb[6].mxu1  ;;  %v775_v61 = vld [vmem:[#allocation2 + $0x30] sm:$0xff] }
 0x1f0   : > { %643 = vst [vmem:[#allocation2 + $0x61] sm:$0xff] %v630_v43  ;;  %v633_v49 = vadd.f32 %v1401_v47, %v2455_v29  ;;  %v624_v50 = vpop.f32.mrb[7].mxu1  ;;  %v773_v60 = vld [vmem:[#allocation2 + $0x18] sm:$0xff] }
 0x1f1   : > { %641 = vst [vmem:[#allocation2 + $0x49] sm:$0xff] %v622_v46  ;;  %v625_v51 = vadd.f32 %v2455_v29, %v624_v50  ;;  %v776_v54 = vld [vmem:[#allocation2 + $0x38] sm:$0xff] }
 0x1f2   : > { %644 = vst [vmem:[#allocation2 + $0x69] sm:$0xff] %v633_v49  ;;  %v774_v53 = vld [vmem:[#allocation2 + $0x20] sm:$0xff]  ;;  %v2483_v57 = vpack.c.bf16 %v633_v49, %v630_v43  ;;  %v2498_v2 = vpack.c.bf16 %v776_v54, %v775_v61  ;;  %v885_v42 = vld [vmem:[#allocation2 + $0x32] sm:$0xff]  ;;  %v862_v61 = vmul.bf16 %v2532_v25, %v2462_v39 }
 0x1f3   : > { %642 = vst [vmem:[#allocation2 + $0x51] sm:$0xff] %v625_v51  ;;  %v2487_v59 = vpack.c.bf16 %v625_v51, %v622_v46  ;;  %v2496_v1 = vpack.c.bf16 %v774_v53, %v773_v60  ;;  %v883_v27 = vld [vmem:[#allocation2 + $0x1a] sm:$0xff]  ;;  %v884_v28 = vld [vmem:[#allocation2 + $0x22] sm:$0xff]  ;;  %v2558_v53 = vrot.slane %v790_v55, %v805_v52  ;;  %v924_v52 = vpack.i.b16 %v769_v38, %v769_v38 }
 0x1f4   : > { %v808_v13 = vmul.bf16 %v2503_v3, %v2498_v2  ;;  %v798_v32 = vmul.bf16 %v2494_v62, %v2498_v2  ;;  %v886_v43 = vld [vmem:[#allocation2 + $0x3a] sm:$0xff]  ;;  %v2554_v51 = vpack.c.bf16 %v884_v28, %v883_v27  ;;  %v875_v28 = vmul.bf16 %v2542_v36, %v2483_v57 }
 0x1f5   : > { %v685_v63 = vpop.f32.mrb[8].mxu1  ;;  %v797_v12 = vmul.bf16 %v2494_v62, %v2496_v1  ;;  %v770_v54 = vld [vmem:[%s2860_s0] sm:$0x1]  ;;  %v874_v11 = vmul.bf16 %v2542_v36, %v2487_v59  ;;  %s1942_s0 = smov [#allocation12]  }
 0x1f6   : > { %v686_v4 = vadd.f32 %v2455_v29, %v685_v63  ;;  %v1408_v5 = vpop.f32.mrb[9].mxu1  ;;  %v904_v58 = vmul.bf16 %v2558_v53, %v2554_v51  ;;  %v939_v10 = vpack.i.b16 %v770_v54, %v770_v54  ;;  %s1775_s4 = sshll.u32 %s1942_s0, 4  ;;  %s1776_s4 = int_to_ptr.vmem [resolvable:$false] %s1775_s4 }
 0x1f7   : > { %v688_v6 = vpop.f32.mrb[10].mxu1  ;;  %v779_v18 = vld [vmem:[#allocation2 + $0x60] sm:$0xff]  ;;  %v812_v30 = vadd.bf16 %v808_v13, %v797_v12  ;;  %v863_v13 = vmul.bf16 %v2532_v25, %v2487_v59  ;;  %s1777_s13 = scalar_lea.vmem %s1776_s4, 2048  ;;  %p1778_p2 = scmp.lt.s32.totalorder %s2660_s3, %s1776_s4 }
 0x1f8   : > { %v2506_v7 = vmul.f32 %v695_v0, %v686_v4  ;;  %v689_v8 = vadd.f32 %v2455_v29, %v688_v6  ;;  %v1409_v9 = vpop.f32.mrb[11].mxu1  ;;  %v777_v16 = vld [vmem:[#allocation2 + $0x48] sm:$0xff]  ;;  %v2570_v4 = vpack.c.bf16 %v886_v43, %v885_v42  ;;  %v819_v42 = vmul.bf16 %v2519_v19, %v2498_v2  ;;  %p1779_p5 = scmp.lt.s32.totalorder %s1777_s13, %s1771_s27 }
 0x1f9   : > { %v780_v14 = vld [vmem:[#allocation2 + $0x68] sm:$0xff]  ;;  %v2601_v43 = vrot.slane %v939_v10, %v2481_v56  ;;  %v864_v10 = vmul.bf16 %v2532_v25, %v2483_v57 }
 0x1fa   : > { %698 = vst [vmem:[#allocation2 + $0x1] sm:$0xff] %v2506_v7  ;;  %v2517_v15 = vmul.f32 %v695_v0, %v689_v8  ;;  %v778_v17 = vld [vmem:[#allocation2 + $0x50] sm:$0xff]  ;;  %v2527_v22 = vpack.c.bf16 %v780_v14, %v779_v18  ;;  %v851_v0 = vmul.bf16 %v2523_v20, %v2462_v39  ;;  %v905_v38 = vmul.bf16 %v2558_v53, %v2570_v4  ;;  %p1780_p6 = por %p1779_p5, %p1778_p2 }
 0x1fb   : > { %v2525_v21 = vpack.c.bf16 %v778_v17, %v777_v16  ;;  %v887_v55 = vld [vmem:[#allocation2 + $0x4a] sm:$0xff]  ;;  %v888_v5 = vld [vmem:[#allocation2 + $0x52] sm:$0xff]  ;;  %v889_v16 = vld [vmem:[#allocation2 + $0x62] sm:$0xff] }
 0x1fc   : > { %699 = vst [vmem:[#allocation2 + $0x9] sm:$0xff] %v2517_v15  ;;  %v839_v24 = vpack.c.bf16 %v2517_v15, %v2506_v7  ;;  %v821_v47 = vmul.bf16 %v2519_v19, %v2527_v22  ;;  %v890_v17 = vld [vmem:[#allocation2 + $0x6a] sm:$0xff]  ;;  %p1781_p9 = pnand %p1780_p6, %p1774_p1 }
 0x1fd   : > { %v740_v26 = vpop.f32.mrb[12].mxu1  ;;  %v820_v31 = vmul.bf16 %v2519_v19, %v2525_v21  ;;  %v809_v33 = vmul.bf16 %v2503_v3, %v2525_v21 }
 0x1fe   : > { %v741_v34 = vadd.f32 %v2455_v29, %v740_v26  ;;  %v1416_v35 = vpop.f32.mrb[13].mxu1  ;;  %v2584_v26 = vpack.c.bf16 %v888_v5, %v887_v55  ;;  %v849_v2 = vmul.bf16 %v2523_v20, %v839_v24  ;;  %v861_v55 = vmul.bf16 %v2532_v25, %v2464_v40 }
 0x1ff   : > { %v743_v37 = vpop.f32.mrb[14].mxu1  ;;  %v824_v44 = vadd.bf16 %v820_v31, %v812_v30  ;;  %v813_v46 = vadd.bf16 %v809_v33, %v798_v32  ;;  %v807_v31 = vmul.bf16 %v2503_v3, %v2496_v1  ;;  %v2592_v32 = vrot.slane %v924_v52, %v2481_v56 }
 0x200   : > { %v2551_v48 = vmul.f32 %v750_v23, %v741_v34  ;;  %v744_v49 = vadd.f32 %v2455_v29, %v743_v37  ;;  %v1417_v50 = vpop.f32.mrb[15].mxu1  ;;  %v916_v33 = vmul.bf16 %v2573_v45, %v2570_v4  ;;  %v897_v37 = vpack.c.bf16 %v890_v17, %v889_v16 }
 0x201   : > { %v854_v60 = vadd.bf16 %v850_v41, %v824_v44  ;;  %v825_v63 = vadd.bf16 %v821_v47, %v813_v46  ;;  %v771_v6 = vld [vmem:[#allocation2] sm:$0xff]  ;;  %v931_v47 = vmul.bf16 %v2592_v32, %v2584_v26  ;;  %v799_v56 = vmul.bf16 %v2494_v62, %v2525_v21 }
 0x202   : > { %754 = vst [vmem:[#allocation2 + $0x79] sm:$0xff] %v2551_v48  ;;  %v2568_v29 = vmul.f32 %v750_v23, %v744_v49  ;;  %v917_v49 = vmul.bf16 %v2573_v45, %v2584_v26 }
 0x203   : > { %v772_v8 = vld [vmem:[#allocation2 + $0x8] sm:$0xff]  ;;  %v866_v9 = vadd.bf16 %v862_v61, %v854_v60  ;;  %v855_v12 = vadd.bf16 %v851_v0, %v825_v63  ;;  %v810_v60 = vmul.bf16 %v2503_v3, %v2527_v22  ;;  %v932_v0 = vmul.bf16 %v2592_v32, %v897_v37 }
 0x204   : > { %755 = vst [vmem:[#allocation2 + $0x81] sm:$0xff] %v2568_v29  ;;  %v783_v14 = vpack.c.bf16 %v772_v8, %v771_v6  ;;  %v844_v18 = vpack.c.bf16 %v2568_v29, %v2551_v48  ;;  %v881_v1 = vld [vmem:[#allocation2 + $0x2] sm:$0xff]  ;;  %v882_v44 = vld [vmem:[#allocation2 + $0xa] sm:$0xff] }
 0x205   : > { %v878_v23 = vadd.bf16 %v874_v11, %v866_v9  ;;  %v867_v27 = vadd.bf16 %v863_v13, %v855_v12  ;;  %v893_v5 = vpack.c.bf16 %v882_v44, %v881_v1  ;;  %v814_v3 = vadd.bf16 %v810_v60, %v799_v56 }
 0x206   : > { %v796_v30 = vmul.bf16 %v2494_v62, %v783_v14  ;;  %v873_v62 = vmul.bf16 %v2542_v36, %v2462_v39  ;;  %v852_v12 = vmul.bf16 %v2523_v20, %v2487_v59  ;;  %v930_v59 = vmul.bf16 %v2592_v32, %v2570_v4 }
 0x207   : > { %v908_v34 = vadd.bf16 %v904_v58, %v878_v23  ;;  %v879_v35 = vadd.bf16 %v875_v28, %v867_v27  ;;  %v903_v9 = vmul.bf16 %v2558_v53, %v893_v5 }
 0x208   : > { %v811_v41 = vadd.bf16 %v807_v31, %v796_v30  ;;  %v876_v30 = vmul.bf16 %v2542_v36, %v844_v18 }
 0x209   : > { %v920_v46 = vadd.bf16 %v916_v33, %v908_v34  ;;  %v909_v48 = vadd.bf16 %v905_v38, %v879_v35  ;;  %v781_v50 = vld [vmem:[#allocation2 + $0x78] sm:$0xff]  ;;  %v906_v35 = vmul.bf16 %v2558_v53, %v2584_v26 }
 0x20a   : > { %v823_v54 = vadd.bf16 %v819_v42, %v811_v41  ;;  %v918_v42 = vmul.bf16 %v2573_v45, %v897_v37 }
 0x20b   : > { %v935_v61 = vadd.bf16 %v931_v47, %v920_v46  ;;  %v921_v63 = vadd.bf16 %v917_v49, %v909_v48  ;;  %v782_v29 = vld [vmem:[#allocation2 + $0x80] sm:$0xff] }
 0x20c   : > { %v853_v52 = vadd.bf16 %v849_v2, %v823_v54  ;;  %v788_v6 = vpack.c.bf16 %v782_v29, %v781_v50  ;;  %v891_v23 = vld [vmem:[#allocation2 + $0x7a] sm:$0xff]  ;;  %v892_v27 = vld [vmem:[#allocation2 + $0x82] sm:$0xff] }
 0x20d   : > { %v2619_v7 = vadd.bf16 %v2601_v43, %v935_v61  ;;  %v936_v15 = vadd.bf16 %v932_v0, %v921_v63 }
 0x20e   : > { %v865_v24 = vadd.bf16 %v861_v55, %v853_v52  ;;  %v822_v21 = vmul.bf16 %v2519_v19, %v788_v6  ;;  %v915_v19 = vmul.bf16 %v2573_v45, %v2554_v51  ;;  %v898_v51 = vpack.c.bf16 %v892_v27, %v891_v23 }
 0x20f   : > { %v950_v22 = vmul.bf16 %v2619_v7, %v2619_v7  ;;  %v2627_v8 = vadd.bf16 %v2601_v43, %v936_v15 }
 0x210   : > { %v877_v40 = vadd.bf16 %v873_v62, %v865_v24  ;;  %v826_v11 = vadd.bf16 %v822_v21, %v814_v3  ;;  %v933_v36 = vmul.bf16 %v2592_v32, %v898_v51  ;;  %v1348_v21 = vld [vmem:[%s2862_s9] ss:$0 sm:$0xff] }
 0x211   : > { %v954_v13 = vmul.bf16 %v950_v22, %v2619_v7  ;;  %v951_v39 = vmul.bf16 %v2627_v8, %v2627_v8 }
 0x212   : > { %v907_v14 = vadd.bf16 %v903_v9, %v877_v40  ;;  %v856_v58 = vadd.bf16 %v852_v12, %v826_v11 }
 0x213   : > { %v958_v16 = vmul.bf16 1027030327, %v954_v13  ;;  %v955_v17 = vmul.bf16 %v951_v39, %v2627_v8 }
 0x214   : > { %v919_v28 = vadd.bf16 %v915_v19, %v907_v14  ;;  %v868_v20 = vadd.bf16 %v864_v10, %v856_v58 }
 0x215   : > { %v959_v31 = vmul.bf16 1027030327, %v955_v17  ;;  %v962_v57 = vadd.bf16 %v958_v16, %v2619_v7 }
 0x216   : > { %v934_v33 = vadd.bf16 %v930_v59, %v919_v28  ;;  %v880_v34 = vadd.bf16 %v876_v30, %v868_v20 }
 0x217   : > { %v963_v38 = vadd.bf16 %v959_v31, %v2627_v8  ;;  %v966_v18 = vmul.bf16 1061961548, %v962_v57 }
 0x218   : > { %v945_v25 = vadd.bf16 %v2601_v43, %v934_v33  ;;  %v910_v41 = vadd.bf16 %v906_v35, %v880_v34 }
 0x219   : > { %v967_v46 = vmul.bf16 1061961548, %v963_v38  ;;  %1617 = vtanh.bf16 %v966_v18 }
 0x21a   : > { %v949_v4 = vmul.bf16 %v945_v25, %v945_v25  ;;  %v922_v1 = vadd.bf16 %v918_v42, %v910_v41 }
 0x21b   : > { %1619 = vtanh.bf16 %v967_v46 }
 0x21c   : > { %v953_v44 = vmul.bf16 %v949_v4, %v945_v25  ;;  %v937_v47 = vadd.bf16 %v933_v36, %v922_v1 }
 0x21e   : > { %v957_v48 = vmul.bf16 1027030327, %v953_v44  ;;  %v948_v53 = vadd.bf16 %v2601_v43, %v937_v47 }
 0x220   : > { %v961_v26 = vadd.bf16 %v957_v48, %v945_v25  ;;  %v952_v49 = vmul.bf16 %v948_v53, %v948_v53 }
 0x222   : > { %v965_v50 = vmul.bf16 1061961548, %v961_v26  ;;  %v956_v54 = vmul.bf16 %v952_v49, %v948_v53 }
 0x224   : > { %1621 = vtanh.bf16 %v965_v50  ;;  %v960_v2 = vmul.bf16 1027030327, %v956_v54  ;;  %v1618_v56 = vpop.eup %1617 }
 0x225   : > { %v974_v60 = vadd.bf16 1065369472, %v1618_v56 }
 0x226   : > { %v964_v45 = vadd.bf16 %v960_v2, %v948_v53  ;;  %v1620_v32 = vpop.eup %1619 }
 0x227   : > { %v975_v61 = vadd.bf16 1065369472, %v1620_v32  ;;  %v978_v29 = vmul.bf16 1056980736, %v974_v60 }
 0x228   : > { %v968_v37 = vmul.bf16 1061961548, %v964_v45 }
 0x229   : > { %v979_v43 = vmul.bf16 1056980736, %v975_v61  ;;  %v982_v6 = vmul.bf16 %v978_v29, %v2619_v7 }
 0x22a   : > { %1623 = vtanh.bf16 %v968_v37 }
 0x22b   : > { %v983_v15 = vmul.bf16 %v979_v43, %v2627_v8 }
 0x22f   : > { %v1622_v63 = vpop.eup %1621 }
 0x230   : > { %v973_v0 = vadd.bf16 1065369472, %v1622_v63 }
 0x232   : > { %v977_v52 = vmul.bf16 1056980736, %v973_v0 }
 0x234   : > { %v981_v55 = vmul.bf16 %v977_v52, %v945_v25 }
 0x235   : > { %v1624_v5 = vpop.eup %1623 }
 0x236   : > { %1434 = vmatprep.mubr.bf16.mxu0 %v981_v55  ;;  %v976_v24 = vadd.bf16 1065369472, %v1624_v5 }
 0x237   : > { %1435 = vmatmul.mubr.bf16.vlgmr.msra.gmra.mrb[0].mxu0 %v982_v6 }
 0x238   : > { %1438 = vmatprep.mubr.bf16.mxu0 %v983_v15  ;;  %v980_v62 = vmul.bf16 1056980736, %v976_v24 }
 0x23a   : > { %v984_v3 = vmul.bf16 %v980_v62, %v948_v53 }
 0x23f   : > { %1439 = vmatmul.mubr.bf16.gmra.mrb[4].mxu0 %v984_v3 }
 0x30a   : > { %v1436_v22 = vpop.f32.mrb[0].mxu0 }
 0x30b   : > { %v1099_v40 = vadd.f32 %v1436_v22, %v1348_v21  ;;  %v1090_v9 = vpop.f32.mrb[1].mxu0 }
 0x30c   : > { %v1091_v11 = vadd.f32 %v1348_v21, %v1090_v9  ;;  %v1437_v7 = vpop.f32.mrb[2].mxu0 }
 0x30d   : > { %1123 = vst [vmem:[%s507_s6 + $0x10] sm:$0xff] %v1099_v40  ;;  %v1102_v8 = vadd.f32 %v1437_v7, %v1348_v21  ;;  %v1093_v12 = vpop.f32.mrb[3].mxu0 }
 0x30e   : > { %1121 = vst [vmem:[%s507_s6] sm:$0xff] %v1091_v11  ;;  %v1094_v13 = vadd.f32 %v1348_v21, %v1093_v12 }
 0x30f   : > { %1124 = vst [vmem:[%s507_s6 + $0x18] sm:$0xff] %v1102_v8 }
 0x310   : > { %1122 = vst [vmem:[%s507_s6 + $0x8] sm:$0xff] %v1094_v13 }
 0x312   : > { %v1440_v39 = vpop.f32.mrb[4].mxu0 }
 0x313   : > { %v1115_v14 = vadd.f32 %v1440_v39, %v1348_v21  ;;  %v1106_v19 = vpop.f32.mrb[5].mxu0 }
 0x314   : > { %v1107_v58 = vadd.f32 %v1348_v21, %v1106_v19  ;;  %v1441_v10 = vpop.f32.mrb[6].mxu0 }
 0x315   : > { %1127 = vst [vmem:[%s507_s6 + $0x30] sm:$0xff] %v1115_v14  ;;  %v1118_v16 = vadd.f32 %v1441_v10, %v1348_v21  ;;  %v1109_v17 = vpop.f32.mrb[7].mxu0 }
 0x316   : > { %1125 = vst [vmem:[%s507_s6 + $0x20] sm:$0xff] %v1107_v58  ;;  %v1110_v23 = vadd.f32 %v1348_v21, %v1109_v17 }
 0x317   : > { %1128 = vst [vmem:[%s507_s6 + $0x38] sm:$0xff] %v1118_v16 }
 0x318   : > { %1126 = vst [vmem:[%s507_s6 + $0x28] sm:$0xff] %v1110_v23 }
 0x319   : > { %1784 = shalt.err (!%p1781_p9)
}
 0x31a   : > { %s1785_s24 = scalar_lea.hbm %s2665_s25, 1024  ;;  %s1789_s29 = scalar_lea.hbm %s2865_s26, 8192 }
 0x31b   : > { %p1786_p11 = scmp.ne.s32.totalorder %s2665_s25, %s1785_s24  ;;  %p1790_p4 = scmp.lt.u32.totalorder %s2665_s25, %s2865_s26 }
 0x31c   : > { %p1791_p10 = scmp.lt.u32.totalorder %s1789_s29, %s1785_s24  ;;  %p1793_p8 = scmp.lt.u32.totalorder %s1785_s24, %s2665_s25 }
 0x31d   : > { %p1787_p3 = pnand %p1786_p11, %p2866_p0 }
 0x31e   : > { %p1792_p12 = por %p1791_p10, %p1790_p4 }
 0x31f   : > { %p1788_p7 = pneg %p1787_p3 }
 0x320   : > { %p1794_p13 = por %p1793_p8, %p1792_p12 }
 0x322   : > { %p1795_p1 = pnand %p1794_p13, %p1788_p7 }
 0x324   : > { %1798 = shalt.err (!%p1795_p1)
}
 0x325   : > { %s1943_s21 = smov 128   ;;  %s1944_s7 = smov 8  }
 0x326   : > { %1456 = dma.vmem_to_hbm [thread:$0]  (%p2866_p0), %s2660_s3, 1024, %s2665_s25, %s1130_s1, %s1943_s21, %s1943_s21, %s1944_s7  }
 0x327 PF: > { %p1484_p2 = scmp.ge.s32.totalorder %s1929_s22, 2  ;;  %s1161_s23 = sand.u32 1, %s1901_s15  }
 0x328   : > { %p2867_p5 = scmp.ne.s32.totalorder %s2828_s11, 0  ;;  %s1162_s30 = scalar_lea.sflag [#allocation5], %s1161_s23 }
 0x32a   : > { %p1476_p6 = pnand %p1484_p2, %p2867_p5 }
 0x32c   : > { %1872 = dma.done.wait (!%p1476_p6), %s1162_s30, 1024  }
 0x32d   : > { %1874 = vsyncadd (!%p1476_p6), %s1162_s30, 4294966272  ;;  %s29_s22 = sadd.s32 1, %s1929_s22   ;;  %s2869_s30 = sld [smem:[#allocation19_spill]] }
 0x32e   : > { %p2696_p9 = scmp.ge.s32.totalorder %s29_s22, 10   ;;  %s2870_s10 = sld [smem:[#allocation20_spill]] }
 0x32f   : > { %s2871_s18 = sld [smem:[#allocation21_spill]]  ;;  %s2872_s3 = smov %s2155_s12 }
 0x330   : > { %s2873_s20 = sld [smem:[#allocation24_spill]]  ;;  %s2874_s25 = sld [smem:[#allocation25_spill]] }
 0x331   : > { %s2875_s1 = sld [smem:[#allocation27_spill]]  ;;  %s2876_s21 = sld [smem:[#allocation28_spill]] }
 0x332   : > { %s2877_s11 = smov %s2902_s5  ;;  %s2879_s13 = smov %s1897_s14 }
 0x333   : > { %s2880_s14 = smov %s2872_s3  ;;  %s2881_s15 = smov %s1905_s16 }
 0x334   : > { %s2882_s16 = smov %s1909_s17  ;;  %s2883_s17 = smov %s2246_s19 }
 0x335   : > { %s2878_s12 = smov %s2871_s18  ;;  %28 = sbr.rel (!%p2696_p9) target bundleno = 24 (0x18), region = 135 }
 0x336   : > { %s2884_s18 = smov %s2873_s20  ;;  %s2885_s19 = smov %s2874_s25 }
 0x337   : > { %s2886_s20 = smov %s2875_s1 }
 0x33c   :  { %1167 = vsyncpa [#allocation4], 1 }
 0x33d   :  { %1169 = vsyncpa [#allocation4 + $0x1], 1 }
 0x33e   :  { %1170 = vsyncpa [#allocation7], 1 }
 0x33f   :  { %1172 = vsyncpa [#allocation7 + $0x1], 1 }
 0x340   :  { %1173 = vsyncpa [#allocation10], 1 }
 0x341   :  { %1174 = vsyncpa [#allocation5], 1 }
 0x342   :  { %1176 = vsyncpa [#allocation5 + $0x1], 1 }

</bundles_post_ra>
